<compile_context>
chip_gen: v7x
topology: tpu7x:2x2x1
jax: 0.10.0
libtpu: 0.0.40
codegen_flags: <defaults>
</compile_context>

<pallas_src>
import numpy as np
import jax
import jax.numpy as jnp
from jax import lax
from jax.experimental import pallas as pl
from jax.experimental.pallas import tpu as pltpu

DNA_SIZE = 16
BATCH_TILE = 8  # samples per grid step; multiple of 8 keeps every slice sublane-aligned


def _conv_out(n):
    # kernel=3, stride=2, no padding
    return (n - 3) // 2 + 1


def _round_up(a, b):
    return (a + b - 1) // b * b


# ----------------------------------------------------------------------------- kernel
def encoder_kernel(p1_ref, w1_ref, b1_ref, w2_ref, b2_ref, w3_ref, b3_ref, out_ref):
    nb, dna = out_ref.shape          # samples handled by this grid step
    c1 = w1_ref.shape[1]             # 16
    c2 = w2_ref.shape[1]             # 32
    grp = 9 * nb                     # rows per conv2-tap group (pos2-major, sample-minor)

    # conv1: ONE matmul over all (tap2, pos2, sample) rows; im2col was built wrapper-side.
    h1 = jnp.dot(p1_ref[...], w1_ref[...],
                 preferred_element_type=jnp.float32) + b1_ref[...]
    h1 = jnp.maximum(h1, 0.0)                                     # (9*grp, 16)

    # conv2: 9 per-tap matmuls accumulated in f32.  Each tap's patch is a contiguous,
    # 8-aligned row slice of h1 (no selection matrices, no lane concatenation).
    acc2 = jnp.zeros((grp, c2), jnp.float32)
    for k in range(9):
        acc2 = acc2 + jnp.dot(h1[k * grp:(k + 1) * grp, :],
                              w2_ref[k * c1:(k + 1) * c1, :],
                              preferred_element_type=jnp.float32)
    h2 = jnp.maximum(acc2 + b2_ref[...], 0.0)                     # (9*nb, 32) rows=(pos2, n)

    # conv3: 3x3/stride-2 over a 3x3 map -> 1x1 output, so max over W then H is the
    # identity; accumulate its 9 per-position matmuls straight into the (nb, dna) result.
    # TODO(synk): for input sizes where conv3's output is >1x1, reshape to (nb, hw3, dna)
    # and take a single jnp.max(axis=1) here instead.
    acc3 = jnp.zeros((nb, dna), jnp.float32)
    for p in range(9):
        acc3 = acc3 + jnp.dot(h2[p * nb:(p + 1) * nb, :],
                              w3_ref[p * c2:(p + 1) * c2, :],
                              preferred_element_type=jnp.float32)
    out_ref[...] = acc3 + b3_ref[...]


# ----------------------------------------------------------------------------- wrapper
def _build_conv1_patches(x_nhwc, n_pad, batch_tile):
    """Wrapper-side (XLA) im2col for conv1, reordered for the kernel.

    Row order (outer->inner): batch tile, conv2 tap k2, conv2 output position p2,
    sample-within-tile.  Columns: conv1 tap-major / cin-minor, matching
    w1.reshape(9*Cin, Cout).  Cheap O(N) strided slices + one static gather.
    """
    n, h, w, c = x_nhwc.shape
    h1, w1 = _conv_out(h), _conv_out(w)        # 16 -> 7
    h2, w2 = _conv_out(h1), _conv_out(w1)      # 7  -> 3
    assert (h2, w2) == (3, 3) and _conv_out(h2) == 1, (
        "kernel is specialized to 16x16 inputs (conv3 output must be 1x1)")
    if n_pad > n:
        x_nhwc = jnp.concatenate(
            [x_nhwc, jnp.zeros((n_pad - n, h, w, c), x_nhwc.dtype)], axis=0)

    # Standard conv1 im2col over its full 7x7 output grid: (n_pad, 7, 7, 9*c)
    cols = [x_nhwc[:, ky:ky + 2 * h1 - 1:2, kx:kx + 2 * w1 - 1:2, :]
            for ky in range(3) for kx in range(3)]
    pf = jnp.concatenate(cols, axis=-1)

    # conv1 output position needed by each (conv2 tap k2, conv2 output position p2).
    ky2, kx2 = np.divmod(np.arange(9), 3)
    oh2, ow2 = np.divmod(np.arange(9), 3)
    h_idx = 2 * oh2[None, :] + ky2[:, None]    # (9 taps, 9 positions)
    w_idx = 2 * ow2[None, :] + kx2[:, None]
    gathered = pf[:, h_idx, w_idx, :]          # (n_pad, k2, p2, 9*c)

    t = n_pad // batch_tile
    gathered = gathered.reshape(t, batch_tile, 9, 9, 9 * c)
    gathered = jnp.transpose(gathered, (0, 2, 3, 1, 4))   # (t, k2, p2, sample, 9*c)
    return gathered.reshape(t * 9 * 9 * batch_tile, 9 * c)


def prepare_params(params_hwio):
    """Flatten HWIO conv weights to (9*Cin, Cout) tap-major/cin-minor + row-vector biases."""
    (w1, b1), (w2, b2), (w3, b3) = params_hwio
    return dict(
        w1=w1.reshape(-1, w1.shape[3]), b1=b1.reshape(1, -1),
        w2=w2.reshape(-1, w2.shape[3]), b2=b2.reshape(1, -1),
        w3=w3.reshape(-1, w3.shape[3]), b3=b3.reshape(1, -1),
    )


def encoder_forward(x_nchw, params, batch_tile=BATCH_TILE):
    x_nhwc = jnp.transpose(x_nchw, (0, 2, 3, 1)).astype(jnp.float32)
    n = x_nhwc.shape[0]
    n_pad = _round_up(n, batch_tile)
    p1 = _build_conv1_patches(x_nhwc, n_pad, batch_tile)   # (t*81*batch_tile, 36)
    dna = params["w3"].shape[1]
    t = n_pad // batch_tile
    rows_per_step = 9 * 9 * batch_tile

    weight_args = (params["w1"], params["b1"], params["w2"], params["b2"],
                   params["w3"], params["b3"])

    def const_spec(a):
        nd = a.ndim
        return pl.BlockSpec(a.shape, lambda i, _nd=nd: (0,) * _nd)

    out = pl.pallas_call(
        encoder_kernel,
        out_shape=jax.ShapeDtypeStruct((n_pad, dna), jnp.float32),
        grid=(t,),
        in_specs=[pl.BlockSpec((rows_per_step, p1.shape[1]), lambda i: (i, 0))]
                 + [const_spec(a) for a in weight_args],
        out_specs=pl.BlockSpec((batch_tile, dna), lambda i: (i, 0)),
        compiler_params=pltpu.CompilerParams(dimension_semantics=("parallel",)),
    )(p1, *weight_args)
    return out[:n]


# ----------------------------------------------------------------------------- reference
def ref_forward(x_nchw, params_hwio):
    """Pure-JAX reference (NHWC conv) for correctness checking."""
    h = jnp.transpose(x_nchw, (0, 2, 3, 1)).astype(jnp.float32)
    for i, (w, b) in enumerate(params_hwio):
        h = lax.conv_general_dilated(
            h, w, window_strides=(2, 2), padding="VALID",
            dimension_numbers=("NHWC", "HWIO", "NHWC")) + b.reshape(1, 1, 1, -1)
        if i < len(params_hwio) - 1:
            h = jnp.maximum(h, 0.0)
    return jnp.max(h, axis=(1, 2))


def init_params(key, dna_size):
    shapes = [(3, 3, 4, 16), (3, 3, 16, 32), (3, 3, 32, dna_size)]
    params_hwio = []
    for shp in shapes:
        key, kw, kb = jax.random.split(key, 3)
        w = jax.random.normal(kw, shp, jnp.float32) * 0.1
        b = jax.random.normal(kb, (shp[-1],), jnp.float32) * 0.05
        params_hwio.append((w, b))
    return params_hwio


if __name__ == "__main__":
    key = jax.random.PRNGKey(0)
    key, kx = jax.random.split(key)

    N, C, H, W = 2, 4, 16, 16
    x = jax.random.normal(kx, (N, C, H, W), jnp.float32)     # NCHW, as in PyTorch

    params_hwio = init_params(key, DNA_SIZE)
    params = prepare_params(params_hwio)

    out = jax.block_until_ready(encoder_forward(x, params))

    ref = ref_forward(x, params_hwio)
    assert out.shape == (N, DNA_SIZE), out.shape
    np.testing.assert_allclose(np.asarray(out), np.asarray(ref), rtol=1e-4, atol=1e-4)

    print("KERNEL_OK")
</pallas_src>

<mosaic_0001>
module attributes {stable_mosaic.version = 11 : i64} {
  func.func @encoder_kernel(%arg0: i32, %arg1: memref<648x36xf32, #tpu.memory_space<vmem>>, %arg2: memref<36x16xf32, #tpu.memory_space<vmem>>, %arg3: memref<1x16xf32, #tpu.memory_space<vmem>>, %arg4: memref<144x32xf32, #tpu.memory_space<vmem>>, %arg5: memref<1x32xf32, #tpu.memory_space<vmem>>, %arg6: memref<288x16xf32, #tpu.memory_space<vmem>>, %arg7: memref<1x16xf32, #tpu.memory_space<vmem>>, %arg8: memref<8x16xf32, #tpu.memory_space<vmem>>) attributes {dimension_semantics = [#tpu.dimension_semantics<parallel>], iteration_bounds = array<i64: 1>, scalar_prefetch = 0 : i64, scratch_operands = 0 : i64, tpu.core_type = #tpu.core_type<tc>, window_params = [{transform_indices = @transform_0, window_bounds = array<i64: 648, 36>}, {pipeline_mode = #tpu.pipeline_mode<synchronous>, transform_indices = @transform_1, window_bounds = array<i64: 36, 16>}, {pipeline_mode = #tpu.pipeline_mode<synchronous>, transform_indices = @transform_2, window_bounds = array<i64: 1, 16>}, {pipeline_mode = #tpu.pipeline_mode<synchronous>, transform_indices = @transform_3, window_bounds = array<i64: 144, 32>}, {pipeline_mode = #tpu.pipeline_mode<synchronous>, transform_indices = @transform_4, window_bounds = array<i64: 1, 32>}, {pipeline_mode = #tpu.pipeline_mode<synchronous>, transform_indices = @transform_5, window_bounds = array<i64: 288, 16>}, {pipeline_mode = #tpu.pipeline_mode<synchronous>, transform_indices = @transform_6, window_bounds = array<i64: 1, 16>}, {transform_indices = @transform_7, window_bounds = array<i64: 8, 16>}]} {
    %c0 = arith.constant 0 : index
    %c0_0 = arith.constant 0 : index
    %0 = vector.load %arg1[%c0, %c0_0] : memref<648x36xf32, #tpu.memory_space<vmem>>, vector<648x36xf32>
    %c0_1 = arith.constant 0 : index
    %c0_2 = arith.constant 0 : index
    %1 = vector.load %arg2[%c0_1, %c0_2] : memref<36x16xf32, #tpu.memory_space<vmem>>, vector<36x16xf32>
    %cst = arith.constant dense<0.000000e+00> : vector<648x16xf32>
    %2 = tpu.matmul %0, %1, %cst {dimension_numbers = #tpu.dot_dimension_numbers<[1], [0], [0], [1], [0, 0, 1, 1], [], []>} : vector<648x36xf32>, vector<36x16xf32>, vector<648x16xf32> -> vector<648x16xf32>
    %c0_3 = arith.constant 0 : index
    %c0_4 = arith.constant 0 : index
    %3 = vector.load %arg3[%c0_3, %c0_4] : memref<1x16xf32, #tpu.memory_space<vmem>>, vector<1x16xf32>
    %4 = vector.broadcast %3 : vector<1x16xf32> to vector<648x16xf32>
    %5 = arith.addf %2, %4 : vector<648x16xf32>
    %cst_5 = arith.constant 0.000000e+00 : f32
    %6 = vector.broadcast %cst_5 : f32 to vector<648x16xf32>
    %7 = arith.maximumf %5, %6 : vector<648x16xf32>
    %cst_6 = arith.constant 0.000000e+00 : f32
    %8 = vector.broadcast %cst_6 : f32 to vector<72x32xf32>
    %9 = vector.extract_strided_slice %7 {offsets = [0, 0], sizes = [72, 16], strides = [1, 1]} : vector<648x16xf32> to vector<72x16xf32>
    %c0_7 = arith.constant 0 : index
    %c0_8 = arith.constant 0 : index
    %10 = vector.load %arg4[%c0_7, %c0_8] : memref<144x32xf32, #tpu.memory_space<vmem>>, vector<16x32xf32>
    %cst_9 = arith.constant dense<0.000000e+00> : vector<72x32xf32>
    %11 = tpu.matmul %9, %10, %cst_9 {dimension_numbers = #tpu.dot_dimension_numbers<[1], [0], [0], [1], [0, 0, 1, 1], [], []>} : vector<72x16xf32>, vector<16x32xf32>, vector<72x32xf32> -> vector<72x32xf32>
    %12 = arith.addf %8, %11 : vector<72x32xf32>
    %13 = vector.extract_strided_slice %7 {offsets = [72, 0], sizes = [72, 16], strides = [1, 1]} : vector<648x16xf32> to vector<72x16xf32>
    %c16 = arith.constant 16 : index
    %c0_10 = arith.constant 0 : index
    %14 = vector.load %arg4[%c16, %c0_10] : memref<144x32xf32, #tpu.memory_space<vmem>>, vector<16x32xf32>
    %cst_11 = arith.constant dense<0.000000e+00> : vector<72x32xf32>
    %15 = tpu.matmul %13, %14, %cst_11 {dimension_numbers = #tpu.dot_dimension_numbers<[1], [0], [0], [1], [0, 0, 1, 1], [], []>} : vector<72x16xf32>, vector<16x32xf32>, vector<72x32xf32> -> vector<72x32xf32>
    %16 = arith.addf %12, %15 : vector<72x32xf32>
    %17 = vector.extract_strided_slice %7 {offsets = [144, 0], sizes = [72, 16], strides = [1, 1]} : vector<648x16xf32> to vector<72x16xf32>
    %c32 = arith.constant 32 : index
    %c0_12 = arith.constant 0 : index
    %18 = vector.load %arg4[%c32, %c0_12] : memref<144x32xf32, #tpu.memory_space<vmem>>, vector<16x32xf32>
    %cst_13 = arith.constant dense<0.000000e+00> : vector<72x32xf32>
    %19 = tpu.matmul %17, %18, %cst_13 {dimension_numbers = #tpu.dot_dimension_numbers<[1], [0], [0], [1], [0, 0, 1, 1], [], []>} : vector<72x16xf32>, vector<16x32xf32>, vector<72x32xf32> -> vector<72x32xf32>
    %20 = arith.addf %16, %19 : vector<72x32xf32>
    %21 = vector.extract_strided_slice %7 {offsets = [216, 0], sizes = [72, 16], strides = [1, 1]} : vector<648x16xf32> to vector<72x16xf32>
    %c48 = arith.constant 48 : index
    %c0_14 = arith.constant 0 : index
    %22 = vector.load %arg4[%c48, %c0_14] : memref<144x32xf32, #tpu.memory_space<vmem>>, vector<16x32xf32>
    %cst_15 = arith.constant dense<0.000000e+00> : vector<72x32xf32>
    %23 = tpu.matmul %21, %22, %cst_15 {dimension_numbers = #tpu.dot_dimension_numbers<[1], [0], [0], [1], [0, 0, 1, 1], [], []>} : vector<72x16xf32>, vector<16x32xf32>, vector<72x32xf32> -> vector<72x32xf32>
    %24 = arith.addf %20, %23 : vector<72x32xf32>
    %25 = vector.extract_strided_slice %7 {offsets = [288, 0], sizes = [72, 16], strides = [1, 1]} : vector<648x16xf32> to vector<72x16xf32>
    %c64 = arith.constant 64 : index
    %c0_16 = arith.constant 0 : index
    %26 = vector.load %arg4[%c64, %c0_16] : memref<144x32xf32, #tpu.memory_space<vmem>>, vector<16x32xf32>
    %cst_17 = arith.constant dense<0.000000e+00> : vector<72x32xf32>
    %27 = tpu.matmul %25, %26, %cst_17 {dimension_numbers = #tpu.dot_dimension_numbers<[1], [0], [0], [1], [0, 0, 1, 1], [], []>} : vector<72x16xf32>, vector<16x32xf32>, vector<72x32xf32> -> vector<72x32xf32>
    %28 = arith.addf %24, %27 : vector<72x32xf32>
    %29 = vector.extract_strided_slice %7 {offsets = [360, 0], sizes = [72, 16], strides = [1, 1]} : vector<648x16xf32> to vector<72x16xf32>
    %c80 = arith.constant 80 : index
    %c0_18 = arith.constant 0 : index
    %30 = vector.load %arg4[%c80, %c0_18] : memref<144x32xf32, #tpu.memory_space<vmem>>, vector<16x32xf32>
    %cst_19 = arith.constant dense<0.000000e+00> : vector<72x32xf32>
    %31 = tpu.matmul %29, %30, %cst_19 {dimension_numbers = #tpu.dot_dimension_numbers<[1], [0], [0], [1], [0, 0, 1, 1], [], []>} : vector<72x16xf32>, vector<16x32xf32>, vector<72x32xf32> -> vector<72x32xf32>
    %32 = arith.addf %28, %31 : vector<72x32xf32>
    %33 = vector.extract_strided_slice %7 {offsets = [432, 0], sizes = [72, 16], strides = [1, 1]} : vector<648x16xf32> to vector<72x16xf32>
    %c96 = arith.constant 96 : index
    %c0_20 = arith.constant 0 : index
    %34 = vector.load %arg4[%c96, %c0_20] : memref<144x32xf32, #tpu.memory_space<vmem>>, vector<16x32xf32>
    %cst_21 = arith.constant dense<0.000000e+00> : vector<72x32xf32>
    %35 = tpu.matmul %33, %34, %cst_21 {dimension_numbers = #tpu.dot_dimension_numbers<[1], [0], [0], [1], [0, 0, 1, 1], [], []>} : vector<72x16xf32>, vector<16x32xf32>, vector<72x32xf32> -> vector<72x32xf32>
    %36 = arith.addf %32, %35 : vector<72x32xf32>
    %37 = vector.extract_strided_slice %7 {offsets = [504, 0], sizes = [72, 16], strides = [1, 1]} : vector<648x16xf32> to vector<72x16xf32>
    %c112 = arith.constant 112 : index
    %c0_22 = arith.constant 0 : index
    %38 = vector.load %arg4[%c112, %c0_22] : memref<144x32xf32, #tpu.memory_space<vmem>>, vector<16x32xf32>
    %cst_23 = arith.constant dense<0.000000e+00> : vector<72x32xf32>
    %39 = tpu.matmul %37, %38, %cst_23 {dimension_numbers = #tpu.dot_dimension_numbers<[1], [0], [0], [1], [0, 0, 1, 1], [], []>} : vector<72x16xf32>, vector<16x32xf32>, vector<72x32xf32> -> vector<72x32xf32>
    %40 = arith.addf %36, %39 : vector<72x32xf32>
    %41 = vector.extract_strided_slice %7 {offsets = [576, 0], sizes = [72, 16], strides = [1, 1]} : vector<648x16xf32> to vector<72x16xf32>
    %c128 = arith.constant 128 : index
    %c0_24 = arith.constant 0 : index
    %42 = vector.load %arg4[%c128, %c0_24] : memref<144x32xf32, #tpu.memory_space<vmem>>, vector<16x32xf32>
    %cst_25 = arith.constant dense<0.000000e+00> : vector<72x32xf32>
    %43 = tpu.matmul %41, %42, %cst_25 {dimension_numbers = #tpu.dot_dimension_numbers<[1], [0], [0], [1], [0, 0, 1, 1], [], []>} : vector<72x16xf32>, vector<16x32xf32>, vector<72x32xf32> -> vector<72x32xf32>
    %44 = arith.addf %40, %43 : vector<72x32xf32>
    %c0_26 = arith.constant 0 : index
    %c0_27 = arith.constant 0 : index
    %45 = vector.load %arg5[%c0_26, %c0_27] : memref<1x32xf32, #tpu.memory_space<vmem>>, vector<1x32xf32>
    %46 = vector.broadcast %45 : vector<1x32xf32> to vector<72x32xf32>
    %47 = arith.addf %44, %46 : vector<72x32xf32>
    %cst_28 = arith.constant 0.000000e+00 : f32
    %48 = vector.broadcast %cst_28 : f32 to vector<72x32xf32>
    %49 = arith.maximumf %47, %48 : vector<72x32xf32>
    %cst_29 = arith.constant 0.000000e+00 : f32
    %50 = vector.broadcast %cst_29 : f32 to vector<8x16xf32>
    %51 = vector.extract_strided_slice %49 {offsets = [0, 0], sizes = [8, 32], strides = [1, 1]} : vector<72x32xf32> to vector<8x32xf32>
    %c0_30 = arith.constant 0 : index
    %c0_31 = arith.constant 0 : index
    %52 = vector.load %arg6[%c0_30, %c0_31] : memref<288x16xf32, #tpu.memory_space<vmem>>, vector<32x16xf32>
    %cst_32 = arith.constant dense<0.000000e+00> : vector<8x16xf32>
    %53 = tpu.matmul %51, %52, %cst_32 {dimension_numbers = #tpu.dot_dimension_numbers<[1], [0], [0], [1], [0, 0, 1, 1], [], []>} : vector<8x32xf32>, vector<32x16xf32>, vector<8x16xf32> -> vector<8x16xf32>
    %54 = arith.addf %50, %53 : vector<8x16xf32>
    %55 = vector.extract_strided_slice %49 {offsets = [8, 0], sizes = [8, 32], strides = [1, 1]} : vector<72x32xf32> to vector<8x32xf32>
    %c32_33 = arith.constant 32 : index
    %c0_34 = arith.constant 0 : index
    %56 = vector.load %arg6[%c32_33, %c0_34] : memref<288x16xf32, #tpu.memory_space<vmem>>, vector<32x16xf32>
    %cst_35 = arith.constant dense<0.000000e+00> : vector<8x16xf32>
    %57 = tpu.matmul %55, %56, %cst_35 {dimension_numbers = #tpu.dot_dimension_numbers<[1], [0], [0], [1], [0, 0, 1, 1], [], []>} : vector<8x32xf32>, vector<32x16xf32>, vector<8x16xf32> -> vector<8x16xf32>
    %58 = arith.addf %54, %57 : vector<8x16xf32>
    %59 = vector.extract_strided_slice %49 {offsets = [16, 0], sizes = [8, 32], strides = [1, 1]} : vector<72x32xf32> to vector<8x32xf32>
    %c64_36 = arith.constant 64 : index
    %c0_37 = arith.constant 0 : index
    %60 = vector.load %arg6[%c64_36, %c0_37] : memref<288x16xf32, #tpu.memory_space<vmem>>, vector<32x16xf32>
    %cst_38 = arith.constant dense<0.000000e+00> : vector<8x16xf32>
    %61 = tpu.matmul %59, %60, %cst_38 {dimension_numbers = #tpu.dot_dimension_numbers<[1], [0], [0], [1], [0, 0, 1, 1], [], []>} : vector<8x32xf32>, vector<32x16xf32>, vector<8x16xf32> -> vector<8x16xf32>
    %62 = arith.addf %58, %61 : vector<8x16xf32>
    %63 = vector.extract_strided_slice %49 {offsets = [24, 0], sizes = [8, 32], strides = [1, 1]} : vector<72x32xf32> to vector<8x32xf32>
    %c96_39 = arith.constant 96 : index
    %c0_40 = arith.constant 0 : index
    %64 = vector.load %arg6[%c96_39, %c0_40] : memref<288x16xf32, #tpu.memory_space<vmem>>, vector<32x16xf32>
    %cst_41 = arith.constant dense<0.000000e+00> : vector<8x16xf32>
    %65 = tpu.matmul %63, %64, %cst_41 {dimension_numbers = #tpu.dot_dimension_numbers<[1], [0], [0], [1], [0, 0, 1, 1], [], []>} : vector<8x32xf32>, vector<32x16xf32>, vector<8x16xf32> -> vector<8x16xf32>
    %66 = arith.addf %62, %65 : vector<8x16xf32>
    %67 = vector.extract_strided_slice %49 {offsets = [32, 0], sizes = [8, 32], strides = [1, 1]} : vector<72x32xf32> to vector<8x32xf32>
    %c128_42 = arith.constant 128 : index
    %c0_43 = arith.constant 0 : index
    %68 = vector.load %arg6[%c128_42, %c0_43] : memref<288x16xf32, #tpu.memory_space<vmem>>, vector<32x16xf32>
    %cst_44 = arith.constant dense<0.000000e+00> : vector<8x16xf32>
    %69 = tpu.matmul %67, %68, %cst_44 {dimension_numbers = #tpu.dot_dimension_numbers<[1], [0], [0], [1], [0, 0, 1, 1], [], []>} : vector<8x32xf32>, vector<32x16xf32>, vector<8x16xf32> -> vector<8x16xf32>
    %70 = arith.addf %66, %69 : vector<8x16xf32>
    %71 = vector.extract_strided_slice %49 {offsets = [40, 0], sizes = [8, 32], strides = [1, 1]} : vector<72x32xf32> to vector<8x32xf32>
    %c160 = arith.constant 160 : index
    %c0_45 = arith.constant 0 : index
    %72 = vector.load %arg6[%c160, %c0_45] : memref<288x16xf32, #tpu.memory_space<vmem>>, vector<32x16xf32>
    %cst_46 = arith.constant dense<0.000000e+00> : vector<8x16xf32>
    %73 = tpu.matmul %71, %72, %cst_46 {dimension_numbers = #tpu.dot_dimension_numbers<[1], [0], [0], [1], [0, 0, 1, 1], [], []>} : vector<8x32xf32>, vector<32x16xf32>, vector<8x16xf32> -> vector<8x16xf32>
    %74 = arith.addf %70, %73 : vector<8x16xf32>
    %75 = vector.extract_strided_slice %49 {offsets = [48, 0], sizes = [8, 32], strides = [1, 1]} : vector<72x32xf32> to vector<8x32xf32>
    %c192 = arith.constant 192 : index
    %c0_47 = arith.constant 0 : index
    %76 = vector.load %arg6[%c192, %c0_47] : memref<288x16xf32, #tpu.memory_space<vmem>>, vector<32x16xf32>
    %cst_48 = arith.constant dense<0.000000e+00> : vector<8x16xf32>
    %77 = tpu.matmul %75, %76, %cst_48 {dimension_numbers = #tpu.dot_dimension_numbers<[1], [0], [0], [1], [0, 0, 1, 1], [], []>} : vector<8x32xf32>, vector<32x16xf32>, vector<8x16xf32> -> vector<8x16xf32>
    %78 = arith.addf %74, %77 : vector<8x16xf32>
    %79 = vector.extract_strided_slice %49 {offsets = [56, 0], sizes = [8, 32], strides = [1, 1]} : vector<72x32xf32> to vector<8x32xf32>
    %c224 = arith.constant 224 : index
    %c0_49 = arith.constant 0 : index
    %80 = vector.load %arg6[%c224, %c0_49] : memref<288x16xf32, #tpu.memory_space<vmem>>, vector<32x16xf32>
    %cst_50 = arith.constant dense<0.000000e+00> : vector<8x16xf32>
    %81 = tpu.matmul %79, %80, %cst_50 {dimension_numbers = #tpu.dot_dimension_numbers<[1], [0], [0], [1], [0, 0, 1, 1], [], []>} : vector<8x32xf32>, vector<32x16xf32>, vector<8x16xf32> -> vector<8x16xf32>
    %82 = arith.addf %78, %81 : vector<8x16xf32>
    %83 = vector.extract_strided_slice %49 {offsets = [64, 0], sizes = [8, 32], strides = [1, 1]} : vector<72x32xf32> to vector<8x32xf32>
    %c256 = arith.constant 256 : index
    %c0_51 = arith.constant 0 : index
    %84 = vector.load %arg6[%c256, %c0_51] : memref<288x16xf32, #tpu.memory_space<vmem>>, vector<32x16xf32>
    %cst_52 = arith.constant dense<0.000000e+00> : vector<8x16xf32>
    %85 = tpu.matmul %83, %84, %cst_52 {dimension_numbers = #tpu.dot_dimension_numbers<[1], [0], [0], [1], [0, 0, 1, 1], [], []>} : vector<8x32xf32>, vector<32x16xf32>, vector<8x16xf32> -> vector<8x16xf32>
    %86 = arith.addf %82, %85 : vector<8x16xf32>
    %c0_53 = arith.constant 0 : index
    %c0_54 = arith.constant 0 : index
    %87 = vector.load %arg7[%c0_53, %c0_54] : memref<1x16xf32, #tpu.memory_space<vmem>>, vector<1x16xf32>
    %88 = vector.broadcast %87 : vector<1x16xf32> to vector<8x16xf32>
    %89 = arith.addf %86, %88 : vector<8x16xf32>
    %c0_55 = arith.constant 0 : index
    %c0_56 = arith.constant 0 : index
    %90 = vector.load %arg8[%c0_55, %c0_56] : memref<8x16xf32, #tpu.memory_space<vmem>>, vector<8x16xf32>
    tpu.vector_store %arg8[%c0_55, %c0_56], %89 {strides = array<i32>} : memref<8x16xf32, #tpu.memory_space<vmem>>, vector<8x16xf32>,
    return
  }
  func.func @transform_0(%arg0: i32) -> (i32, i32) {
    %c0_i32 = arith.constant 0 : i32
    %c0_i32_0 = arith.constant 0 : i32
    return %arg0, %c0_i32 : i32, i32
  }
  func.func @transform_1(%arg0: i32) -> (i32, i32) {
    %c0_i32 = arith.constant 0 : i32
    %c0_i32_0 = arith.constant 0 : i32
    %c0_i32_1 = arith.constant 0 : i32
    return %c0_i32, %c0_i32_0 : i32, i32
  }
  func.func @transform_2(%arg0: i32) -> (i32, i32) {
    %c0_i32 = arith.constant 0 : i32
    %c0_i32_0 = arith.constant 0 : i32
    %c0_i32_1 = arith.constant 0 : i32
    return %c0_i32, %c0_i32_0 : i32, i32
  }
  func.func @transform_3(%arg0: i32) -> (i32, i32) {
    %c0_i32 = arith.constant 0 : i32
    %c0_i32_0 = arith.constant 0 : i32
    %c0_i32_1 = arith.constant 0 : i32
    return %c0_i32, %c0_i32_0 : i32, i32
  }
  func.func @transform_4(%arg0: i32) -> (i32, i32) {
    %c0_i32 = arith.constant 0 : i32
    %c0_i32_0 = arith.constant 0 : i32
    %c0_i32_1 = arith.constant 0 : i32
    return %c0_i32, %c0_i32_0 : i32, i32
  }
  func.func @transform_5(%arg0: i32) -> (i32, i32) {
    %c0_i32 = arith.constant 0 : i32
    %c0_i32_0 = arith.constant 0 : i32
    %c0_i32_1 = arith.constant 0 : i32
    return %c0_i32, %c0_i32_0 : i32, i32
  }
  func.func @transform_6(%arg0: i32) -> (i32, i32) {
    %c0_i32 = arith.constant 0 : i32
    %c0_i32_0 = arith.constant 0 : i32
    %c0_i32_1 = arith.constant 0 : i32
    return %c0_i32, %c0_i32_0 : i32, i32
  }
  func.func @transform_7(%arg0: i32) -> (i32, i32) {
    %c0_i32 = arith.constant 0 : i32
    %c0_i32_0 = arith.constant 0 : i32
    return %arg0, %c0_i32 : i32, i32
  }
}

</mosaic_0001>

<bundles_post_ra>
// kernel: tpu_custom_call.1
= control target key start
LH: loop header
LB: loop body
LE: loop exit
PB: predicated region body
PF: predicated region fallthrough
CT: control target
= control target key end

     0   :  { %v4135_v3 = vmov 0.0|0.0   ;;  %vm4136_vm0 = vmmov 0   ;;  %v4137_v6 = vmov 0.0   ;;  %vm364_vm1 = vcmask 1043456   ;;  %s5452_s0 = inlined_call_operand.vmem [shape: f32[648,36], index: 0, kind: input, shape index: {}]   ;;  %s5453_s1 = inlined_call_operand.vmem [shape: f32[36,16], index: 1, kind: input, shape index: {}]   ;;  %s5454_s2 = inlined_call_operand.vmem [shape: f32[1,16], index: 2, kind: input, shape index: {}]   ;;  %s5455_s3 = inlined_call_operand.vmem [shape: f32[144,32], index: 3, kind: input, shape index: {}]   ;;  %s5456_s4 = inlined_call_operand.vmem [shape: f32[1,32], index: 4, kind: input, shape index: {}]   ;;  %s5457_s5 = inlined_call_operand.vmem [shape: f32[288,16], index: 5, kind: input, shape index: {}]   ;;  %s5458_s6 = inlined_call_operand.vmem [shape: f32[1,16], index: 6, kind: input, shape index: {}]   ;;  %s5459_s7 = inlined_call_operand.hbm [shape: f32[8,16], index: 7, kind: output, shape index: {}]  }
   0x1   :  { %v108_v0 = vld [vmem:[%s5453_s1] sm:$0xff]  ;;  %v109_v1 = vld [vmem:[%s5453_s1 + $0x8] sm:$0xff]  ;;  %v110_v2 = vld [vmem:[%s5453_s1 + $0x10] sm:$0xff]  ;;  %4019 = vmatprep.subr.bf16.mxu0 %v4135_v3  ;;  %4025 = vmatprep.subr.bf16.mxu1 %v4135_v3  ;;  %vm120_vm2 = vcmask 293888  }
   0x2   :  { %v4020_v4 = vpack.c.bf16 %v109_v1, %v108_v0  ;;  %v111_v5 = vld [vmem:[%s5453_s1 + $0x18] sm:$0xff]  ;;  %3398 = vmatprep.mubr.msk.f32.mxu0 %vm4136_vm0, %v4137_v6  ;;  %3645 = vmatprep.mubr.msk.f32.mxu1 %vm4136_vm0, %v4137_v6  ;;  %v112_v8 = vld [vmem:[%s5453_s1 + $0x20] sm:$0xf] }
   0x3   :  { %v4023_v7 = vpack.c.bf16 %v111_v5, %v110_v2  ;;  %v27_v9 = vld [vmem:[%s5452_s0] sm:$0xff] }
   0x4   :  { %4021 = vmatpush3.bf16.msra.mxu0 %v4020_v4 }
   0x5   :  { %4022 = vmatprep.subr.bf16.mxu0 %v4135_v3 }
   0x8   :  { %4024 = vmatpush3.bf16.msra.mxu0 %v4023_v7 }
   0x9   :  { %3396 = vmatprep.subr.mxu0 %v4137_v6 }
   0xc   :  { %3397 = vmatpush3.msk.msra.mxu0 %vm364_vm1, %v112_v8 }
   0xd   :  { %3399 = vmatmul.mubr.msk.f32.vlgmr.msra.gmra.mrb[0].mxu0 %vm120_vm2, %v27_v9  ;;  %4058 = vmatprep.subr.bf16.mxu0 %v4135_v3 }
   0xe   :  { %12 = vsyncpa [#allocation3], 0  ;;  %3401 = vmatprep.mubr.msk.f32.mxu0 %vm4136_vm0, %v4137_v6  ;;  %v28_v10 = vld [vmem:[%s5452_s0 + $0x8] sm:$0xff]  ;;  %v29_v11 = vld [vmem:[%s5452_s0 + $0x10] sm:$0xff]  ;;  %vm923_vm3 = vcmask 130048   ;;  %vm2267_vm4 = vcmask 261120  }
   0xf   :  { %v30_v12 = vld [vmem:[%s5452_s0 + $0x18] sm:$0xff]  ;;  %v31_v13 = vld [vmem:[%s5452_s0 + $0x20] sm:$0xff]  ;;  %v32_v14 = vld [vmem:[%s5452_s0 + $0x28] sm:$0xff]  ;;  %s4138_s12 = smov [#allocation2]  }
  0x10   :  { %v33_v15 = vld [vmem:[%s5452_s0 + $0x30] sm:$0xff]  ;;  %v34_v16 = vld [vmem:[%s5452_s0 + $0x38] sm:$0xff]  ;;  %v35_v17 = vld [vmem:[%s5452_s0 + $0x40] sm:$0xff]  ;;  %s2975_s13 = sshll.u32 %s4138_s12, 4  ;;  %s2976_s13 = int_to_ptr.vmem [resolvable:$true] %s2975_s13 }
  0x11   :  { %3402 = vmatmul.mubr.msk.f32.gmra.mrb[2].mxu0 %vm120_vm2, %v28_v10  ;;  %v36_v18 = vld [vmem:[%s5452_s0 + $0x48] sm:$0xff]  ;;  %v37_v19 = vld [vmem:[%s5452_s0 + $0x50] sm:$0xff]  ;;  %v38_v20 = vld [vmem:[%s5452_s0 + $0x58] sm:$0xff]  ;;  %s4111_s14 = scalar_lea.vmem %s2976_s13, 128  ;;  %p4116_p1 = scmp.lt.s32.totalorder %s2976_s13, %s2976_s13 }
  0x12   :  { %3404 = vmatprep.mubr.msk.f32.mxu0 %vm4136_vm0, %v4137_v6  ;;  %v39_v21 = vld [vmem:[%s5452_s0 + $0x60] sm:$0xff]  ;;  %v40_v22 = vld [vmem:[%s5452_s0 + $0x68] sm:$0xff]  ;;  %v41_v23 = vld [vmem:[%s5452_s0 + $0x70] sm:$0xff]  ;;  %p4112_p0 = scmp.ne.s32.totalorder %s2976_s13, %s4111_s14  ;;  %p4117_p2 = scmp.lt.s32.totalorder %s4111_s14, %s4111_s14 }
  0x13   :  { %v42_v24 = vld [vmem:[%s5452_s0 + $0x78] sm:$0xff]  ;;  %v43_v25 = vld [vmem:[%s5452_s0 + $0x80] sm:$0xff]  ;;  %v44_v26 = vld [vmem:[%s5452_s0 + $0x88] sm:$0xff] }
  0x14   :  { %v45_v27 = vld [vmem:[%s5452_s0 + $0x90] sm:$0xff]  ;;  %v46_v28 = vld [vmem:[%s5452_s0 + $0x98] sm:$0xff]  ;;  %v47_v29 = vld [vmem:[%s5452_s0 + $0xa0] sm:$0xff]  ;;  %p4118_p3 = por %p4117_p2, %p4116_p1 }
  0x15   :  { %3405 = vmatmul.mubr.msk.f32.gmra.mrb[4].mxu0 %vm120_vm2, %v29_v11  ;;  %v48_v30 = vld [vmem:[%s5452_s0 + $0xa8] sm:$0xff]  ;;  %v49_v31 = vld [vmem:[%s5452_s0 + $0xb0] sm:$0xff]  ;;  %v50_v32 = vld [vmem:[%s5452_s0 + $0xb8] sm:$0xff] }
  0x16   :  { %3407 = vmatprep.mubr.msk.f32.mxu0 %vm4136_vm0, %v4137_v6  ;;  %v51_v33 = vld [vmem:[%s5452_s0 + $0xc0] sm:$0xff]  ;;  %v52_v34 = vld [vmem:[%s5452_s0 + $0xc8] sm:$0xff]  ;;  %v53_v35 = vld [vmem:[%s5452_s0 + $0xd0] sm:$0xff]  ;;  %p4119_p4 = pnand %p4118_p3, %p4112_p0 }
  0x17   :  { %v54_v36 = vld [vmem:[%s5452_s0 + $0xd8] sm:$0xff]  ;;  %v55_v37 = vld [vmem:[%s5452_s0 + $0xe0] sm:$0xff]  ;;  %v56_v38 = vld [vmem:[%s5452_s0 + $0xe8] sm:$0xff] }
  0x18   :  { %v57_v39 = vld [vmem:[%s5452_s0 + $0xf0] sm:$0xff]  ;;  %v922_v41 = vld [vmem:[%s5455_s3 + $0x18] sm:$0xff]  ;;  %v59_v44 = vld [vmem:[%s5452_s0 + $0x100] sm:$0xff] }
  0x19   :  { %3408 = vmatmul.mubr.msk.f32.gmra.mrb[6].mxu0 %vm120_vm2, %v30_v12  ;;  %v921_v40 = vld [vmem:[%s5455_s3 + $0x10] sm:$0xff]  ;;  %v58_v43 = vld [vmem:[%s5452_s0 + $0xf8] sm:$0xff]  ;;  %v60_v45 = vld [vmem:[%s5452_s0 + $0x108] sm:$0xff] }
  0x1a   :  { %3410 = vmatprep.mubr.msk.f32.mxu0 %vm4136_vm0, %v4137_v6  ;;  %v4026_v42 = vpack.c.bf16 %v922_v41, %v921_v40  ;;  %v61_v46 = vld [vmem:[%s5452_s0 + $0x110] sm:$0xff]  ;;  %v62_v47 = vld [vmem:[%s5452_s0 + $0x118] sm:$0xff]  ;;  %v63_v48 = vld [vmem:[%s5452_s0 + $0x120] sm:$0xff] }
  0x1b   :  { %v64_v49 = vld [vmem:[%s5452_s0 + $0x128] sm:$0xff]  ;;  %v65_v50 = vld [vmem:[%s5452_s0 + $0x130] sm:$0xff]  ;;  %v66_v51 = vld [vmem:[%s5452_s0 + $0x138] sm:$0xff] }
  0x1c   :  { %4027 = vmatpush3.bf16.msra.mxu1 %v4026_v42  ;;  %v67_v52 = vld [vmem:[%s5452_s0 + $0x140] sm:$0xff]  ;;  %v68_v53 = vld [vmem:[%s5452_s0 + $0x148] sm:$0xff]  ;;  %v69_v54 = vld [vmem:[%s5452_s0 + $0x150] sm:$0xff] }
  0x1d   :  { %3411 = vmatmul.mubr.msk.f32.gmra.mrb[8].mxu0 %vm120_vm2, %v31_v13  ;;  %4028 = vmatprep.subr.bf16.mxu1 %v4135_v3  ;;  %v70_v55 = vld [vmem:[%s5452_s0 + $0x158] sm:$0xff]  ;;  %v71_v56 = vld [vmem:[%s5452_s0 + $0x160] sm:$0xff]  ;;  %v72_v57 = vld [vmem:[%s5452_s0 + $0x168] sm:$0xff] }
  0x1e   :  { %3413 = vmatprep.mubr.msk.f32.mxu0 %vm4136_vm0, %v4137_v6  ;;  %v73_v58 = vld [vmem:[%s5452_s0 + $0x170] sm:$0xff]  ;;  %v74_v59 = vld [vmem:[%s5452_s0 + $0x178] sm:$0xff]  ;;  %v75_v60 = vld [vmem:[%s5452_s0 + $0x180] sm:$0xff] }
  0x1f   :  { %v76_v61 = vld [vmem:[%s5452_s0 + $0x188] sm:$0xff]  ;;  %v77_v62 = vld [vmem:[%s5452_s0 + $0x190] sm:$0xff]  ;;  %v78_v63 = vld [vmem:[%s5452_s0 + $0x198] sm:$0xff] }
  0x20   :  { %v79_v0 = vld [vmem:[%s5452_s0 + $0x1a0] sm:$0xff]  ;;  %v80_v1 = vld [vmem:[%s5452_s0 + $0x1a8] sm:$0xff]  ;;  %v81_v5 = vld [vmem:[%s5452_s0 + $0x1b0] sm:$0xff] }
  0x21   :  { %3414 = vmatmul.mubr.msk.f32.gmra.mrb[10].mxu0 %vm120_vm2, %v32_v14  ;;  %v82_v9 = vld [vmem:[%s5452_s0 + $0x1b8] sm:$0xff]  ;;  %v83_v12 = vld [vmem:[%s5452_s0 + $0x1c0] sm:$0xff] }
  0x22   :  { %3416 = vmatprep.mubr.msk.f32.mxu0 %vm4136_vm0, %v4137_v6 }
  0x25   :  { %3417 = vmatmul.mubr.msk.f32.gmra.mrb[12].mxu0 %vm120_vm2, %v33_v15  ;;  %v84_v15 = vld [vmem:[%s5452_s0 + $0x1c8] sm:$0xff] }
  0x26   :  { %3419 = vmatprep.mubr.msk.f32.mxu0 %vm4136_vm0, %v4137_v6 }
  0x29   :  { %3420 = vmatmul.mubr.msk.f32.gmra.mrb[14].mxu0 %vm120_vm2, %v34_v16 }
  0x2a   :  { %3422 = vmatprep.mubr.msk.f32.mxu0 %vm4136_vm0, %v4137_v6 }
  0x2d   :  { %3423 = vmatmul.mubr.msk.f32.gmra.mrb[16].mxu0 %vm120_vm2, %v35_v17 }
  0x2e   :  { %3425 = vmatprep.mubr.msk.f32.mxu0 %vm4136_vm0, %v4137_v6 }
  0x31   :  { %3426 = vmatmul.mubr.msk.f32.gmra.mrb[18].mxu0 %vm120_vm2, %v36_v18  ;;  %v85_v18 = vld [vmem:[%s5452_s0 + $0x1d0] sm:$0xff] }
  0x32   :  { %3428 = vmatprep.mubr.msk.f32.mxu0 %vm4136_vm0, %v4137_v6 }
  0x35   :  { %3429 = vmatmul.mubr.msk.f32.gmra.mrb[20].mxu0 %vm120_vm2, %v37_v19 }
  0x36   :  { %3431 = vmatprep.mubr.msk.f32.mxu0 %vm4136_vm0, %v4137_v6 }
  0x39   :  { %3432 = vmatmul.mubr.msk.f32.gmra.mrb[22].mxu0 %vm120_vm2, %v38_v20 }
  0x3a   :  { %3434 = vmatprep.mubr.msk.f32.mxu0 %vm4136_vm0, %v4137_v6 }
  0x3d   :  { %3435 = vmatmul.mubr.msk.f32.gmra.mrb[24].mxu0 %vm120_vm2, %v39_v21  ;;  %v86_v21 = vld [vmem:[%s5452_s0 + $0x1d8] sm:$0xff] }
  0x3e   :  { %3437 = vmatprep.mubr.msk.f32.mxu0 %vm4136_vm0, %v4137_v6 }
  0x41   :  { %3438 = vmatmul.mubr.msk.f32.gmra.mrb[26].mxu0 %vm120_vm2, %v40_v22 }
  0x42   :  { %3440 = vmatprep.mubr.msk.f32.mxu0 %vm4136_vm0, %v4137_v6 }
  0x45   :  { %3441 = vmatmul.mubr.msk.f32.gmra.mrb[28].mxu0 %vm120_vm2, %v41_v23 }
  0x46   :  { %3443 = vmatprep.mubr.msk.f32.mxu0 %vm4136_vm0, %v4137_v6 }
  0x49   :  { %3444 = vmatmul.mubr.msk.f32.gmra.mrb[30].mxu0 %vm120_vm2, %v42_v24  ;;  %v87_v24 = vld [vmem:[%s5452_s0 + $0x1e0] sm:$0xff] }
  0x4a   :  { %3446 = vmatprep.mubr.msk.f32.mxu0 %vm4136_vm0, %v4137_v6 }
  0x4d   :  { %3447 = vmatmul.mubr.msk.f32.gmra.mrb[32].mxu0 %vm120_vm2, %v43_v25 }
  0x4e   :  { %3449 = vmatprep.mubr.msk.f32.mxu0 %vm4136_vm0, %v4137_v6 }
  0x51   :  { %3450 = vmatmul.mubr.msk.f32.gmra.mrb[34].mxu0 %vm120_vm2, %v44_v26 }
  0x52   :  { %3452 = vmatprep.mubr.msk.f32.mxu0 %vm4136_vm0, %v4137_v6 }
  0x55   :  { %3453 = vmatmul.mubr.msk.f32.gmra.mrb[36].mxu0 %vm120_vm2, %v45_v27  ;;  %v88_v27 = vld [vmem:[%s5452_s0 + $0x1e8] sm:$0xff] }
  0x56   :  { %3455 = vmatprep.mubr.msk.f32.mxu0 %vm4136_vm0, %v4137_v6 }
  0x59   :  { %3456 = vmatmul.mubr.msk.f32.gmra.mrb[38].mxu0 %vm120_vm2, %v46_v28 }
  0x5a   :  { %3458 = vmatprep.mubr.msk.f32.mxu0 %vm4136_vm0, %v4137_v6 }
  0x5d   :  { %3459 = vmatmul.mubr.msk.f32.gmra.mrb[40].mxu0 %vm120_vm2, %v47_v29 }
  0x5e   :  { %3461 = vmatprep.mubr.msk.f32.mxu0 %vm4136_vm0, %v4137_v6 }
  0x61   :  { %3462 = vmatmul.mubr.msk.f32.gmra.mrb[42].mxu0 %vm120_vm2, %v48_v30  ;;  %v89_v30 = vld [vmem:[%s5452_s0 + $0x1f0] sm:$0xff] }
  0x62   :  { %3464 = vmatprep.mubr.msk.f32.mxu0 %vm4136_vm0, %v4137_v6 }
  0x65   :  { %3465 = vmatmul.mubr.msk.f32.gmra.mrb[44].mxu0 %vm120_vm2, %v49_v31  ;;  %v919_v31 = vld [vmem:[%s5455_s3] sm:$0xff] }
  0x66   :  { %3467 = vmatprep.mubr.msk.f32.mxu0 %vm4136_vm0, %v4137_v6 }
  0x69   :  { %3468 = vmatmul.mubr.msk.f32.gmra.mrb[46].mxu0 %vm120_vm2, %v50_v32  ;;  %v920_v32 = vld [vmem:[%s5455_s3 + $0x8] sm:$0xff] }
  0x6a   :  { %3470 = vmatprep.mubr.msk.f32.mxu0 %vm4136_vm0, %v4137_v6 }
  0x6d   :  { %3471 = vmatmul.mubr.msk.f32.gmra.mrb[48].mxu0 %vm120_vm2, %v51_v33  ;;  %v4612_v33 = vld [vmem:[%s5454_s2] ss:$0 sm:$0xff] }
  0x6e   :  { %3473 = vmatprep.mubr.msk.f32.mxu0 %vm4136_vm0, %v4137_v6 }
  0x71   :  { %3474 = vmatmul.mubr.msk.f32.gmra.mrb[50].mxu0 %vm120_vm2, %v52_v34 }
  0x72   :  { %3476 = vmatprep.mubr.msk.f32.mxu0 %vm4136_vm0, %v4137_v6 }
  0x75   :  { %3477 = vmatmul.mubr.msk.f32.gmra.mrb[52].mxu0 %vm120_vm2, %v53_v35 }
  0x76   :  { %3479 = vmatprep.mubr.msk.f32.mxu0 %vm4136_vm0, %v4137_v6 }
  0x79   :  { %3480 = vmatmul.mubr.msk.f32.gmra.mrb[54].mxu0 %vm120_vm2, %v54_v36 }
  0x7a   :  { %3482 = vmatprep.mubr.msk.f32.mxu0 %vm4136_vm0, %v4137_v6 }
  0x7d   :  { %3483 = vmatmul.mubr.msk.f32.gmra.mrb[56].mxu0 %vm120_vm2, %v55_v37  ;;  %v4029_v37 = vpack.c.bf16 %v920_v32, %v919_v31  ;;  %v99_v32 = vld [vmem:[%s5452_s0 + $0x240] sm:$0xff] }
  0x7e   :  { %3485 = vmatprep.mubr.msk.f32.mxu0 %vm4136_vm0, %v4137_v6 }
  0x81   :  { %3486 = vmatmul.mubr.msk.f32.gmra.mrb[58].mxu0 %vm120_vm2, %v56_v38  ;;  %v90_v38 = vld [vmem:[%s5452_s0 + $0x1f8] sm:$0xff] }
  0x82   :  { %3488 = vmatprep.mubr.msk.f32.mxu0 %vm4136_vm0, %v4137_v6 }
  0x85   :  { %3489 = vmatmul.mubr.msk.f32.gmra.mrb[60].mxu0 %vm120_vm2, %v57_v39 }
  0x86   :  { %3491 = vmatprep.mubr.msk.f32.mxu0 %vm4136_vm0, %v4137_v6 }
  0x89   :  { %3492 = vmatmul.mubr.msk.f32.gmra.mrb[62].mxu0 %vm120_vm2, %v58_v43  ;;  %v91_v43 = vld [vmem:[%s5452_s0 + $0x200] sm:$0xff] }
  0x8a   :  { %3494 = vmatprep.mubr.msk.f32.mxu0 %vm4136_vm0, %v4137_v6 }
  0x8d   :  { %3495 = vmatmul.mubr.msk.f32.gmra.mrb[64].mxu0 %vm120_vm2, %v59_v44 }
  0x8e   :  { %3497 = vmatprep.mubr.msk.f32.mxu0 %vm4136_vm0, %v4137_v6 }
  0x91   :  { %3498 = vmatmul.mubr.msk.f32.gmra.mrb[66].mxu0 %vm120_vm2, %v60_v45 }
  0x92   :  { %3500 = vmatprep.mubr.msk.f32.mxu0 %vm4136_vm0, %v4137_v6 }
  0x95   :  { %3501 = vmatmul.mubr.msk.f32.gmra.mrb[68].mxu0 %vm120_vm2, %v61_v46 }
  0x96   :  { %3503 = vmatprep.mubr.msk.f32.mxu0 %vm4136_vm0, %v4137_v6 }
  0x99   :  { %3504 = vmatmul.mubr.msk.f32.gmra.mrb[70].mxu0 %vm120_vm2, %v62_v47 }
  0x9a   :  { %3506 = vmatprep.mubr.msk.f32.mxu0 %vm4136_vm0, %v4137_v6 }
  0x9d   :  { %3507 = vmatmul.mubr.msk.f32.gmra.mrb[72].mxu0 %vm120_vm2, %v63_v48  ;;  %v92_v48 = vld [vmem:[%s5452_s0 + $0x208] sm:$0xff] }
  0x9e   :  { %3509 = vmatprep.mubr.msk.f32.mxu0 %vm4136_vm0, %v4137_v6 }
  0xa1   :  { %3510 = vmatmul.mubr.msk.f32.gmra.mrb[74].mxu0 %vm120_vm2, %v64_v49 }
  0xa2   :  { %3512 = vmatprep.mubr.msk.f32.mxu0 %vm4136_vm0, %v4137_v6 }
  0xa5   :  { %3513 = vmatmul.mubr.msk.f32.gmra.mrb[76].mxu0 %vm120_vm2, %v65_v50 }
  0xa6   :  { %3515 = vmatprep.mubr.msk.f32.mxu0 %vm4136_vm0, %v4137_v6 }
  0xa9   :  { %3516 = vmatmul.mubr.msk.f32.gmra.mrb[78].mxu0 %vm120_vm2, %v66_v51 }
  0xaa   :  { %3518 = vmatprep.mubr.msk.f32.mxu0 %vm4136_vm0, %v4137_v6 }
  0xad   :  { %3519 = vmatmul.mubr.msk.f32.gmra.mrb[80].mxu0 %vm120_vm2, %v67_v52 }
  0xae   :  { %3521 = vmatprep.mubr.msk.f32.mxu0 %vm4136_vm0, %v4137_v6 }
  0xb1   :  { %3522 = vmatmul.mubr.msk.f32.gmra.mrb[82].mxu0 %vm120_vm2, %v68_v53  ;;  %v93_v53 = vld [vmem:[%s5452_s0 + $0x210] sm:$0xff] }
  0xb2   :  { %3524 = vmatprep.mubr.msk.f32.mxu0 %vm4136_vm0, %v4137_v6 }
  0xb5   :  { %3525 = vmatmul.mubr.msk.f32.gmra.mrb[84].mxu0 %vm120_vm2, %v69_v54 }
  0xb6   :  { %3527 = vmatprep.mubr.msk.f32.mxu0 %vm4136_vm0, %v4137_v6 }
  0xb9   :  { %3528 = vmatmul.mubr.msk.f32.gmra.mrb[86].mxu0 %vm120_vm2, %v70_v55 }
  0xba   :  { %3530 = vmatprep.mubr.msk.f32.mxu0 %vm4136_vm0, %v4137_v6 }
  0xbd   :  { %3531 = vmatmul.mubr.msk.f32.gmra.mrb[88].mxu0 %vm120_vm2, %v71_v56 }
  0xbe   :  { %3533 = vmatprep.mubr.msk.f32.mxu0 %vm4136_vm0, %v4137_v6 }
  0xc1   :  { %3534 = vmatmul.mubr.msk.f32.gmra.mrb[90].mxu0 %vm120_vm2, %v72_v57 }
  0xc2   :  { %3536 = vmatprep.mubr.msk.f32.mxu0 %vm4136_vm0, %v4137_v6 }
  0xc5   :  { %3537 = vmatmul.mubr.msk.f32.gmra.mrb[92].mxu0 %vm120_vm2, %v73_v58  ;;  %v94_v58 = vld [vmem:[%s5452_s0 + $0x218] sm:$0xff] }
  0xc6   :  { %3539 = vmatprep.mubr.msk.f32.mxu0 %vm4136_vm0, %v4137_v6 }
  0xc9   :  { %3540 = vmatmul.mubr.msk.f32.gmra.mrb[94].mxu0 %vm120_vm2, %v74_v59 }
  0xca   :  { %3542 = vmatprep.mubr.msk.f32.mxu0 %vm4136_vm0, %v4137_v6 }
  0xcd   :  { %3543 = vmatmul.mubr.msk.f32.gmra.mrb[96].mxu0 %vm120_vm2, %v75_v60 }
  0xce   :  { %3545 = vmatprep.mubr.msk.f32.mxu0 %vm4136_vm0, %v4137_v6 }
  0xd1   :  { %3546 = vmatmul.mubr.msk.f32.gmra.mrb[98].mxu0 %vm120_vm2, %v76_v61 }
  0xd2   :  { %3548 = vmatprep.mubr.msk.f32.mxu0 %vm4136_vm0, %v4137_v6 }
  0xd5   :  { %3549 = vmatmul.mubr.msk.f32.gmra.mrb[100].mxu0 %vm120_vm2, %v77_v62 }
  0xd6   :  { %3551 = vmatprep.mubr.msk.f32.mxu0 %vm4136_vm0, %v4137_v6 }
  0xd9   :  { %3552 = vmatmul.mubr.msk.f32.gmra.mrb[102].mxu0 %vm120_vm2, %v78_v63  ;;  %v95_v63 = vld [vmem:[%s5452_s0 + $0x220] sm:$0xff] }
  0xda   :  { %3554 = vmatprep.mubr.msk.f32.mxu0 %vm4136_vm0, %v4137_v6 }
  0xdd   :  { %3555 = vmatmul.mubr.msk.f32.gmra.mrb[104].mxu0 %vm120_vm2, %v79_v0 }
  0xde   :  { %3557 = vmatprep.mubr.msk.f32.mxu0 %vm4136_vm0, %v4137_v6 }
  0xe0   :  { %v4531_v2 = vpop.f32.mrb[0].mxu0 }
  0xe1   :  { %v3400_v4 = vpop.f32.mrb[1].mxu0  ;;  %3558 = vmatmul.mubr.msk.f32.gmra.mrb[106].mxu0 %vm120_vm2, %v80_v1 }
  0xe2   :  { %3560 = vmatprep.mubr.msk.f32.mxu0 %vm4136_vm0, %v4137_v6 }
  0xe4   :  { %v4539_v7 = vpop.f32.mrb[2].mxu0 }
  0xe5   :  { %v3403_v8 = vpop.f32.mrb[3].mxu0  ;;  %3561 = vmatmul.mubr.msk.f32.gmra.mrb[108].mxu0 %vm120_vm2, %v81_v5 }
  0xe6   :  { %3563 = vmatprep.mubr.msk.f32.mxu0 %vm4136_vm0, %v4137_v6  ;;  %v96_v8 = vld [vmem:[%s5452_s0 + $0x228] sm:$0xff] }
  0xe8   :  { %v4547_v10 = vpop.f32.mrb[4].mxu0 }
  0xe9   :  { %v3406_v11 = vpop.f32.mrb[5].mxu0  ;;  %3564 = vmatmul.mubr.msk.f32.gmra.mrb[110].mxu0 %vm120_vm2, %v82_v9 }
  0xea   :  { %3566 = vmatprep.mubr.msk.f32.mxu0 %vm4136_vm0, %v4137_v6 }
  0xec   :  { %v4555_v13 = vpop.f32.mrb[6].mxu0 }
  0xed   :  { %v3409_v14 = vpop.f32.mrb[7].mxu0  ;;  %3567 = vmatmul.mubr.msk.f32.gmra.mrb[112].mxu0 %vm120_vm2, %v83_v12 }
  0xee   :  { %3569 = vmatprep.mubr.msk.f32.mxu0 %vm4136_vm0, %v4137_v6 }
  0xf0   :  { %v4563_v16 = vpop.f32.mrb[8].mxu0 }
  0xf1   :  { %v3412_v17 = vpop.f32.mrb[9].mxu0  ;;  %3570 = vmatmul.mubr.msk.f32.gmra.mrb[114].mxu0 %vm120_vm2, %v84_v15  ;;  %v97_v15 = vld [vmem:[%s5452_s0 + $0x230] sm:$0xff] }
  0xf2   :  { %3572 = vmatprep.mubr.msk.f32.mxu0 %vm4136_vm0, %v4137_v6 }
  0xf4   :  { %v4571_v19 = vpop.f32.mrb[10].mxu0 }
  0xf5   :  { %v3415_v20 = vpop.f32.mrb[11].mxu0  ;;  %3573 = vmatmul.mubr.msk.f32.gmra.mrb[116].mxu0 %vm120_vm2, %v85_v18 }
  0xf6   :  { %3575 = vmatprep.mubr.msk.f32.mxu0 %vm4136_vm0, %v4137_v6 }
  0xf8   :  { %v4579_v22 = vpop.f32.mrb[12].mxu0 }
  0xf9   :  { %v3418_v23 = vpop.f32.mrb[13].mxu0  ;;  %3576 = vmatmul.mubr.msk.f32.gmra.mrb[118].mxu0 %vm120_vm2, %v86_v21 }
  0xfa   :  { %3578 = vmatprep.mubr.msk.f32.mxu0 %vm4136_vm0, %v4137_v6  ;;  %v98_v23 = vld [vmem:[%s5452_s0 + $0x238] sm:$0xff] }
  0xfc   :  { %v4587_v25 = vpop.f32.mrb[14].mxu0 }
  0xfd   :  { %v3421_v26 = vpop.f32.mrb[15].mxu0  ;;  %3579 = vmatmul.mubr.msk.f32.gmra.mrb[120].mxu0 %vm120_vm2, %v87_v24  ;;  %v435_v24 = vadd.f32 %v4612_v33, %v4531_v2 }
  0xfe   :  { %3581 = vmatprep.mubr.msk.f32.mxu0 %vm4136_vm0, %v4137_v6 }
 0x100   :  { %v4595_v28 = vpop.f32.mrb[16].mxu0 }
 0x101   :  { %v3424_v29 = vpop.f32.mrb[17].mxu0  ;;  %3582 = vmatmul.mubr.msk.f32.gmra.mrb[122].mxu0 %vm120_vm2, %v88_v27  ;;  %v1198_v27 = vld [vmem:[%s5455_s3 + $0x20] sm:$0xff] }
 0x102   :  { %3584 = vmatprep.mubr.msk.f32.mxu0 %vm4136_vm0, %v4137_v6  ;;  %v1199_v29 = vld [vmem:[%s5455_s3 + $0x28] sm:$0xff] }
 0x103   :  { %v4032_v2 = vpack.c.bf16 %v1199_v29, %v1198_v27 }
 0x104   :  { %v479_v34 = vpop.f32.mrb[18].mxu0 }
 0x105   :  { %v480_v35 = vadd.f32 %v4612_v33, %v479_v34  ;;  %v3427_v36 = vpop.f32.mrb[19].mxu0  ;;  %3585 = vmatmul.mubr.msk.f32.gmra.mrb[124].mxu0 %vm120_vm2, %v89_v30  ;;  %v838_v34 = vmax.f32 %v435_v24, 0.0 }
 0x106   :  { %3587 = vmatprep.mubr.msk.f32.mxu0 %vm4136_vm0, %v4137_v6 }
 0x107   :  { %v847_v39 = vmax.f32 %v480_v35, 0.0  ;;  %v440_v35 = vadd.f32 %v4612_v33, %v4539_v7 }
 0x108   :  { %v484_v40 = vpop.f32.mrb[20].mxu0 }
 0x109   :  { %v485_v41 = vadd.f32 %v4612_v33, %v484_v40  ;;  %v3430_v42 = vpop.f32.mrb[21].mxu0  ;;  %3646 = vmatmul.mubr.msk.f32.vlgmr.msra.gmra.mrb[0].mxu1 %vm923_vm3, %v847_v39  ;;  %3588 = vmatmul.mubr.msk.f32.gmra.mrb[126].mxu0 %vm120_vm2, %v90_v38  ;;  %v100_v38 = vld [vmem:[%s5452_s0 + $0x248] sm:$0xff]  ;;  %v839_v39 = vmax.f32 %v440_v35, 0.0  ;;  %v445_v40 = vadd.f32 %v4612_v33, %v4547_v10  ;;  %v101_v10 = vld [vmem:[%s5452_s0 + $0x250] sm:$0xff] }
 0x10a   :  { %4030 = vmatpush3.bf16.msra.mxu1 %v4029_v37  ;;  %3648 = vmatprep.mubr.msk.f32.mxu1 %vm4136_vm0, %v4137_v6 }
 0x10b   :  { %v848_v44 = vmax.f32 %v485_v41, 0.0  ;;  %4031 = vmatprep.subr.bf16.mxu1 %v4135_v3  ;;  %3590 = vmatprep.mubr.msk.f32.mxu0 %vm4136_vm0, %v4137_v6  ;;  %v840_v42 = vmax.f32 %v445_v40, 0.0 }
 0x10c   :  { %v489_v45 = vpop.f32.mrb[22].mxu0 }
 0x10d   :  { %v490_v46 = vadd.f32 %v4612_v33, %v489_v45  ;;  %v3433_v47 = vpop.f32.mrb[23].mxu0  ;;  %3649 = vmatmul.mubr.msk.f32.gmra.mrb[2].mxu1 %vm923_vm3, %v848_v44  ;;  %3591 = vmatmul.mubr.msk.f32.gmra.mrb[128].mxu0 %vm120_vm2, %v91_v43  ;;  %v450_v43 = vadd.f32 %v4612_v33, %v4555_v13  ;;  %v455_v13 = vadd.f32 %v4612_v33, %v4563_v16 }
 0x10e   :  { %3651 = vmatprep.mubr.msk.f32.mxu1 %vm4136_vm0, %v4137_v6  ;;  %3593 = vmatprep.mubr.msk.f32.mxu0 %vm4136_vm0, %v4137_v6  ;;  %v460_v16 = vadd.f32 %v4612_v33, %v4571_v19  ;;  %v465_v19 = vadd.f32 %v4612_v33, %v4579_v22  ;;  %v470_v22 = vadd.f32 %v4612_v33, %v4587_v25 }
 0x10f   :  { %v849_v49 = vmax.f32 %v490_v46, 0.0  ;;  %v102_v46 = vld [vmem:[%s5452_s0 + $0x258] sm:$0xff]  ;;  %v841_v47 = vmax.f32 %v450_v43, 0.0  ;;  %v475_v25 = vadd.f32 %v4612_v33, %v4595_v28  ;;  %v107_v28 = vld [vmem:[%s5452_s0 + $0x280] sm:$0xff] }
 0x110   :  { %v494_v50 = vpop.f32.mrb[24].mxu0 }
 0x111   :  { %v495_v51 = vadd.f32 %v4612_v33, %v494_v50  ;;  %v3436_v52 = vpop.f32.mrb[25].mxu0  ;;  %3652 = vmatmul.mubr.msk.f32.gmra.mrb[4].mxu1 %vm923_vm3, %v849_v49  ;;  %3594 = vmatmul.mubr.msk.f32.gmra.mrb[130].mxu0 %vm120_vm2, %v92_v48  ;;  %v103_v50 = vld [vmem:[%s5452_s0 + $0x260] sm:$0xff] }
 0x112   :  { %3654 = vmatprep.mubr.msk.f32.mxu1 %vm4136_vm0, %v4137_v6  ;;  %3596 = vmatprep.mubr.msk.f32.mxu0 %vm4136_vm0, %v4137_v6 }
 0x113   :  { %v850_v54 = vmax.f32 %v495_v51, 0.0  ;;  %v842_v51 = vmax.f32 %v455_v13, 0.0 }
 0x114   :  { %v499_v55 = vpop.f32.mrb[26].mxu0 }
 0x115   :  { %v500_v56 = vadd.f32 %v4612_v33, %v499_v55  ;;  %v3439_v57 = vpop.f32.mrb[27].mxu0  ;;  %3655 = vmatmul.mubr.msk.f32.gmra.mrb[6].mxu1 %vm923_vm3, %v850_v54  ;;  %3597 = vmatmul.mubr.msk.f32.gmra.mrb[132].mxu0 %vm120_vm2, %v93_v53  ;;  %v104_v54 = vld [vmem:[%s5452_s0 + $0x268] sm:$0xff]  ;;  %v843_v55 = vmax.f32 %v460_v16, 0.0 }
 0x116   :  { %3657 = vmatprep.mubr.msk.f32.mxu1 %vm4136_vm0, %v4137_v6  ;;  %3599 = vmatprep.mubr.msk.f32.mxu0 %vm4136_vm0, %v4137_v6 }
 0x117   :  { %v851_v59 = vmax.f32 %v500_v56, 0.0 }
 0x118   :  { %v504_v60 = vpop.f32.mrb[28].mxu0 }
 0x119   :  { %v505_v61 = vadd.f32 %v4612_v33, %v504_v60  ;;  %v3442_v62 = vpop.f32.mrb[29].mxu0  ;;  %3658 = vmatmul.mubr.msk.f32.gmra.mrb[8].mxu1 %vm923_vm3, %v851_v59  ;;  %3600 = vmatmul.mubr.msk.f32.gmra.mrb[134].mxu0 %vm120_vm2, %v94_v58  ;;  %v105_v58 = vld [vmem:[%s5452_s0 + $0x270] sm:$0xff]  ;;  %v844_v59 = vmax.f32 %v465_v19, 0.0 }
 0x11a   :  { %3660 = vmatprep.mubr.msk.f32.mxu1 %vm4136_vm0, %v4137_v6  ;;  %3602 = vmatprep.mubr.msk.f32.mxu0 %vm4136_vm0, %v4137_v6  ;;  %v106_v62 = vld [vmem:[%s5452_s0 + $0x278] sm:$0xff] }
 0x11b   :  { %v852_v0 = vmax.f32 %v505_v61, 0.0 }
 0x11c   :  { %v509_v1 = vpop.f32.mrb[30].mxu0 }
 0x11d   :  { %v510_v4 = vadd.f32 %v4612_v33, %v509_v1  ;;  %v3445_v5 = vpop.f32.mrb[31].mxu0  ;;  %3661 = vmatmul.mubr.msk.f32.gmra.mrb[10].mxu1 %vm923_vm3, %v852_v0  ;;  %3603 = vmatmul.mubr.msk.f32.gmra.mrb[136].mxu0 %vm120_vm2, %v95_v63  ;;  %v845_v63 = vmax.f32 %v470_v22, 0.0 }
 0x11e   :  { %3663 = vmatprep.mubr.msk.f32.mxu1 %vm4136_vm0, %v4137_v6  ;;  %3605 = vmatprep.mubr.msk.f32.mxu0 %vm4136_vm0, %v4137_v6  ;;  %v2259_v5 = vld [vmem:[%s5457_s5] sm:$0xff] }
 0x11f   :  { %v853_v9 = vmax.f32 %v510_v4, 0.0 }
 0x120   :  { %v514_v11 = vpop.f32.mrb[32].mxu0 }
 0x121   :  { %v515_v12 = vadd.f32 %v4612_v33, %v514_v11  ;;  %v3448_v14 = vpop.f32.mrb[33].mxu0  ;;  %3664 = vmatmul.mubr.msk.f32.gmra.mrb[12].mxu1 %vm923_vm3, %v853_v9  ;;  %3606 = vmatmul.mubr.msk.f32.gmra.mrb[138].mxu0 %vm120_vm2, %v96_v8  ;;  %v2260_v8 = vld [vmem:[%s5457_s5 + $0x8] sm:$0xff]  ;;  %v846_v11 = vmax.f32 %v475_v25, 0.0 }
 0x122   :  { %3666 = vmatprep.mubr.msk.f32.mxu1 %vm4136_vm0, %v4137_v6  ;;  %3608 = vmatprep.mubr.msk.f32.mxu0 %vm4136_vm0, %v4137_v6  ;;  %v4059_v9 = vpack.c.bf16 %v2260_v8, %v2259_v5  ;;  %v1347_v14 = vld [vmem:[%s5455_s3 + $0x38] sm:$0xff] }
 0x123   :  { %v854_v17 = vmax.f32 %v515_v12, 0.0  ;;  %v1346_v12 = vld [vmem:[%s5455_s3 + $0x30] sm:$0xff] }
 0x124   :  { %v519_v18 = vpop.f32.mrb[34].mxu0  ;;  %4060 = vmatpush3.bf16.msra.mxu0 %v4059_v9 }
 0x125   :  { %v520_v20 = vadd.f32 %v4612_v33, %v519_v18  ;;  %v3451_v21 = vpop.f32.mrb[35].mxu0  ;;  %3667 = vmatmul.mubr.msk.f32.gmra.mrb[14].mxu1 %vm923_vm3, %v854_v17  ;;  %3609 = vmatmul.mubr.msk.f32.gmra.mrb[140].mxu0 %vm120_vm2, %v97_v15 }
 0x126   :  { %3669 = vmatprep.mubr.msk.f32.mxu1 %vm4136_vm0, %v4137_v6  ;;  %3611 = vmatprep.mubr.msk.f32.mxu0 %vm4136_vm0, %v4137_v6  ;;  %v4035_v21 = vpack.c.bf16 %v1347_v14, %v1346_v12 }
 0x127   :  { %v855_v26 = vmax.f32 %v520_v20, 0.0  ;;  %4061 = vmatprep.subr.bf16.mxu0 %v4135_v3 }
 0x128   :  { %v4710_v30 = vpop.f32.mrb[36].mxu0 }
 0x129   :  { %3670 = vmatmul.mubr.msk.f32.gmra.mrb[16].mxu1 %vm923_vm3, %v855_v26  ;;  %v3454_v31 = vpop.f32.mrb[37].mxu0  ;;  %3612 = vmatmul.mubr.msk.f32.gmra.mrb[142].mxu0 %vm120_vm2, %v98_v23  ;;  %v525_v1 = vadd.f32 %v4612_v33, %v4710_v30 }
 0x12a   :  { %3676 = vmatprep.mubr.msk.f32.mxu1 %vm4136_vm0, %v4137_v6  ;;  %3614 = vmatprep.mubr.msk.f32.mxu0 %vm4136_vm0, %v4137_v6 }
 0x12b   :  { %v856_v17 = vmax.f32 %v525_v1, 0.0 }
 0x12c   :  { %v4723_v36 = vpop.f32.mrb[38].mxu0 }
 0x12d   :  { %3677 = vmatmul.mubr.msk.f32.vlgmr.msra.gmra.mrb[18].mxu1 %vm923_vm3, %v838_v34  ;;  %v3457_v37 = vpop.f32.mrb[39].mxu0  ;;  %3615 = vmatmul.mubr.msk.f32.gmra.mrb[144].mxu0 %vm120_vm2, %v99_v32  ;;  %v530_v18 = vadd.f32 %v4612_v33, %v4723_v36 }
 0x12e   :  { %4033 = vmatpush3.bf16.msra.mxu1 %v4032_v2  ;;  %3679 = vmatprep.mubr.msk.f32.mxu1 %vm4136_vm0, %v4137_v6 }
 0x12f   :  { %4034 = vmatprep.subr.bf16.mxu1 %v4135_v3  ;;  %3617 = vmatprep.mubr.msk.f32.mxu0 %vm4136_vm0, %v4137_v6  ;;  %v857_v24 = vmax.f32 %v530_v18, 0.0 }
 0x130   :  { %v4737_v7 = vpop.f32.mrb[40].mxu0 }
 0x131   :  { %3680 = vmatmul.mubr.msk.f32.gmra.mrb[20].mxu1 %vm923_vm3, %v839_v39  ;;  %v3460_v41 = vpop.f32.mrb[41].mxu0  ;;  %3618 = vmatmul.mubr.msk.f32.gmra.mrb[146].mxu0 %vm120_vm2, %v100_v38  ;;  %v535_v26 = vadd.f32 %v4612_v33, %v4737_v7 }
 0x132   :  { %3682 = vmatprep.mubr.msk.f32.mxu1 %vm4136_vm0, %v4137_v6  ;;  %3620 = vmatprep.mubr.msk.f32.mxu0 %vm4136_vm0, %v4137_v6 }
 0x133   :  { %v858_v30 = vmax.f32 %v535_v26, 0.0 }
 0x134   :  { %v4750_v44 = vpop.f32.mrb[42].mxu0 }
 0x135   :  { %3683 = vmatmul.mubr.msk.f32.gmra.mrb[22].mxu1 %vm923_vm3, %v840_v42  ;;  %v3463_v45 = vpop.f32.mrb[43].mxu0  ;;  %3621 = vmatmul.mubr.msk.f32.gmra.mrb[148].mxu0 %vm120_vm2, %v101_v10  ;;  %v540_v31 = vadd.f32 %v4612_v33, %v4750_v44 }
 0x136   :  { %3685 = vmatprep.mubr.msk.f32.mxu1 %vm4136_vm0, %v4137_v6  ;;  %3623 = vmatprep.mubr.msk.f32.mxu0 %vm4136_vm0, %v4137_v6 }
 0x137   :  { %v859_v34 = vmax.f32 %v540_v31, 0.0 }
 0x138   :  { %v4763_v48 = vpop.f32.mrb[44].mxu0 }
 0x139   :  { %3686 = vmatmul.mubr.msk.f32.gmra.mrb[24].mxu1 %vm923_vm3, %v841_v47  ;;  %v3466_v49 = vpop.f32.mrb[45].mxu0  ;;  %3624 = vmatmul.mubr.msk.f32.gmra.mrb[150].mxu0 %vm120_vm2, %v102_v46  ;;  %v545_v35 = vadd.f32 %v4612_v33, %v4763_v48 }
 0x13a   :  { %3688 = vmatprep.mubr.msk.f32.mxu1 %vm4136_vm0, %v4137_v6  ;;  %3626 = vmatprep.mubr.msk.f32.mxu0 %vm4136_vm0, %v4137_v6 }
 0x13b   :  { %v860_v38 = vmax.f32 %v545_v35, 0.0  ;;  %v1642_v35 = vld [vmem:[%s5455_s3 + $0x50] sm:$0xff] }
 0x13c   :  { %v4776_v52 = vpop.f32.mrb[46].mxu0 }
 0x13d   :  { %3689 = vmatmul.mubr.msk.f32.gmra.mrb[26].mxu1 %vm923_vm3, %v842_v51  ;;  %v3469_v53 = vpop.f32.mrb[47].mxu0  ;;  %3627 = vmatmul.mubr.msk.f32.gmra.mrb[152].mxu0 %vm120_vm2, %v103_v50  ;;  %v550_v39 = vadd.f32 %v4612_v33, %v4776_v52 }
 0x13e   :  { %3691 = vmatprep.mubr.msk.f32.mxu1 %vm4136_vm0, %v4137_v6  ;;  %3629 = vmatprep.mubr.msk.f32.mxu0 %vm4136_vm0, %v4137_v6  ;;  %v1494_v53 = vld [vmem:[%s5455_s3 + $0x40] sm:$0xff] }
 0x13f   :  { %v861_v41 = vmax.f32 %v550_v39, 0.0 }
 0x140   :  { %v4789_v56 = vpop.f32.mrb[48].mxu0 }
 0x141   :  { %3692 = vmatmul.mubr.msk.f32.gmra.mrb[28].mxu1 %vm923_vm3, %v843_v55  ;;  %v3472_v57 = vpop.f32.mrb[49].mxu0  ;;  %3630 = vmatmul.mubr.msk.f32.gmra.mrb[154].mxu0 %vm120_vm2, %v104_v54  ;;  %v555_v10 = vadd.f32 %v4612_v33, %v4789_v56  ;;  %v1495_v54 = vld [vmem:[%s5455_s3 + $0x48] sm:$0xff] }
 0x142   :  { %3694 = vmatprep.mubr.msk.f32.mxu1 %vm4136_vm0, %v4137_v6  ;;  %3632 = vmatprep.mubr.msk.f32.mxu0 %vm4136_vm0, %v4137_v6 }
 0x143   :  { %v862_v44 = vmax.f32 %v555_v10, 0.0 }
 0x144   :  { %v4802_v60 = vpop.f32.mrb[50].mxu0 }
 0x145   :  { %3695 = vmatmul.mubr.msk.f32.gmra.mrb[30].mxu1 %vm923_vm3, %v844_v59  ;;  %v3475_v61 = vpop.f32.mrb[51].mxu0  ;;  %3633 = vmatmul.mubr.msk.f32.gmra.mrb[156].mxu0 %vm120_vm2, %v105_v58  ;;  %v560_v45 = vadd.f32 %v4612_v33, %v4802_v60  ;;  %v4038_v58 = vpack.c.bf16 %v1495_v54, %v1494_v53 }
 0x146   :  { %3697 = vmatprep.mubr.msk.f32.mxu1 %vm4136_vm0, %v4137_v6  ;;  %3635 = vmatprep.mubr.msk.f32.mxu0 %vm4136_vm0, %v4137_v6 }
 0x147   :  { %v863_v13 = vmax.f32 %v560_v45, 0.0 }
 0x148   :  { %v4815_v0 = vpop.f32.mrb[52].mxu0 }
 0x149   :  { %3698 = vmatmul.mubr.msk.f32.gmra.mrb[32].mxu1 %vm923_vm3, %v845_v63  ;;  %v3478_v4 = vpop.f32.mrb[53].mxu0  ;;  %3636 = vmatmul.mubr.msk.f32.gmra.mrb[158].mxu0 %vm120_vm2, %v106_v62  ;;  %v565_v48 = vadd.f32 %v4612_v33, %v4815_v0 }
 0x14a   :  { %3700 = vmatprep.mubr.msk.f32.mxu1 %vm4136_vm0, %v4137_v6  ;;  %3638 = vmatprep.mubr.msk.f32.mxu0 %vm4136_vm0, %v4137_v6 }
 0x14b   :  { %v864_v51 = vmax.f32 %v565_v48, 0.0 }
 0x14c   :  { %v569_v15 = vpop.f32.mrb[54].mxu0 }
 0x14d   :  { %3701 = vmatmul.mubr.msk.f32.gmra.mrb[34].mxu1 %vm923_vm3, %v846_v11  ;;  %v3481_v20 = vpop.f32.mrb[55].mxu0  ;;  %3639 = vmatmul.mubr.msk.f32.gmra.mrb[160].mxu0 %vm120_vm2, %v107_v28  ;;  %v570_v16 = vadd.f32 %v4612_v33, %v569_v15 }
 0x14e   :  { %3707 = vmatprep.mubr.msk.f32.mxu1 %vm4136_vm0, %v4137_v6  ;;  %3939 = vmatprep.mubr.msk.f32.mxu0 %vm4136_vm0, %v4137_v6 }
 0x14f   :  { %v865_v19 = vmax.f32 %v570_v16, 0.0 }
 0x150   :  { %v574_v23 = vpop.f32.mrb[56].mxu0 }
 0x151   :  { %3708 = vmatmul.mubr.msk.f32.vlgmr.msra.gmra.mrb[36].mxu1 %vm923_vm3, %v856_v17  ;;  %v3484_v27 = vpop.f32.mrb[57].mxu0  ;;  %v575_v56 = vadd.f32 %v4612_v33, %v574_v23 }
 0x152   :  { %4036 = vmatpush3.bf16.msra.mxu1 %v4035_v21  ;;  %3710 = vmatprep.mubr.msk.f32.mxu1 %vm4136_vm0, %v4137_v6 }
 0x153   :  { %4037 = vmatprep.subr.bf16.mxu1 %v4135_v3  ;;  %v866_v22 = vmax.f32 %v575_v56, 0.0 }
 0x154   :  { %v579_v29 = vpop.f32.mrb[58].mxu0 }
 0x155   :  { %3711 = vmatmul.mubr.msk.f32.gmra.mrb[38].mxu1 %vm923_vm3, %v857_v24  ;;  %v3487_v2 = vpop.f32.mrb[59].mxu0  ;;  %v580_v60 = vadd.f32 %v4612_v33, %v579_v29 }
 0x156   :  { %3713 = vmatprep.mubr.msk.f32.mxu1 %vm4136_vm0, %v4137_v6 }
 0x157   :  { %v867_v63 = vmax.f32 %v580_v60, 0.0 }
 0x158   :  { %v584_v32 = vpop.f32.mrb[60].mxu0 }
 0x159   :  { %3714 = vmatmul.mubr.msk.f32.gmra.mrb[40].mxu1 %vm923_vm3, %v858_v30  ;;  %v3490_v36 = vpop.f32.mrb[61].mxu0  ;;  %v585_v25 = vadd.f32 %v4612_v33, %v584_v32 }
 0x15a   :  { %3716 = vmatprep.mubr.msk.f32.mxu1 %vm4136_vm0, %v4137_v6  ;;  %v1643_v36 = vld [vmem:[%s5455_s3 + $0x58] sm:$0xff] }
 0x15b   :  { %v868_v4 = vmax.f32 %v585_v25, 0.0 }
 0x15c   :  { %v589_v37 = vpop.f32.mrb[62].mxu0 }
 0x15d   :  { %3717 = vmatmul.mubr.msk.f32.gmra.mrb[42].mxu1 %vm923_vm3, %v859_v34  ;;  %v3493_v40 = vpop.f32.mrb[63].mxu0  ;;  %v590_v5 = vadd.f32 %v4612_v33, %v589_v37 }
 0x15e   :  { %3719 = vmatprep.mubr.msk.f32.mxu1 %vm4136_vm0, %v4137_v6 }
 0x15f   :  { %v869_v9 = vmax.f32 %v590_v5, 0.0  ;;  %v1790_v5 = vld [vmem:[%s5455_s3 + $0x60] sm:$0xff] }
 0x160   :  { %v594_v7 = vpop.f32.mrb[64].mxu0 }
 0x161   :  { %3720 = vmatmul.mubr.msk.f32.gmra.mrb[44].mxu1 %vm923_vm3, %v860_v38  ;;  %v3496_v42 = vpop.f32.mrb[65].mxu0  ;;  %v595_v11 = vadd.f32 %v4612_v33, %v594_v7  ;;  %v4041_v7 = vpack.c.bf16 %v1643_v36, %v1642_v35 }
 0x162   :  { %3722 = vmatprep.mubr.msk.f32.mxu1 %vm4136_vm0, %v4137_v6 }
 0x163   :  { %v870_v15 = vmax.f32 %v595_v11, 0.0 }
 0x164   :  { %v599_v43 = vpop.f32.mrb[66].mxu0 }
 0x165   :  { %3723 = vmatmul.mubr.msk.f32.gmra.mrb[46].mxu1 %vm923_vm3, %v861_v41  ;;  %v3499_v46 = vpop.f32.mrb[67].mxu0  ;;  %v600_v17 = vadd.f32 %v4612_v33, %v599_v43 }
 0x166   :  { %3725 = vmatprep.mubr.msk.f32.mxu1 %vm4136_vm0, %v4137_v6 }
 0x167   :  { %v871_v21 = vmax.f32 %v600_v17, 0.0 }
 0x168   :  { %v604_v47 = vpop.f32.mrb[68].mxu0 }
 0x169   :  { %3726 = vmatmul.mubr.msk.f32.gmra.mrb[48].mxu1 %vm923_vm3, %v862_v44  ;;  %v3502_v49 = vpop.f32.mrb[69].mxu0  ;;  %v605_v23 = vadd.f32 %v4612_v33, %v604_v47 }
 0x16a   :  { %3728 = vmatprep.mubr.msk.f32.mxu1 %vm4136_vm0, %v4137_v6 }
 0x16b   :  { %v872_v27 = vmax.f32 %v605_v23, 0.0 }
 0x16c   :  { %v609_v50 = vpop.f32.mrb[70].mxu0 }
 0x16d   :  { %3729 = vmatmul.mubr.msk.f32.gmra.mrb[50].mxu1 %vm923_vm3, %v863_v13  ;;  %v3505_v52 = vpop.f32.mrb[71].mxu0  ;;  %v610_v29 = vadd.f32 %v4612_v33, %v609_v50 }
 0x16e   :  { %3731 = vmatprep.mubr.msk.f32.mxu1 %vm4136_vm0, %v4137_v6 }
 0x16f   :  { %v873_v2 = vmax.f32 %v610_v29, 0.0 }
 0x170   :  { %v614_v55 = vpop.f32.mrb[72].mxu0 }
 0x171   :  { %3732 = vmatmul.mubr.msk.f32.gmra.mrb[52].mxu1 %vm923_vm3, %v864_v51  ;;  %v3508_v57 = vpop.f32.mrb[73].mxu0  ;;  %v615_v32 = vadd.f32 %v4612_v33, %v614_v55 }
 0x172   :  { %3738 = vmatprep.mubr.msk.f32.mxu1 %vm4136_vm0, %v4137_v6 }
 0x173   :  { %v874_v38 = vmax.f32 %v615_v32, 0.0 }
 0x174   :  { %v619_v59 = vpop.f32.mrb[74].mxu0 }
 0x175   :  { %3739 = vmatmul.mubr.msk.f32.vlgmr.msra.gmra.mrb[54].mxu1 %vm923_vm3, %v865_v19  ;;  %v3511_v61 = vpop.f32.mrb[75].mxu0  ;;  %v620_v39 = vadd.f32 %v4612_v33, %v619_v59 }
 0x176   :  { %4039 = vmatpush3.bf16.msra.mxu1 %v4038_v58  ;;  %3741 = vmatprep.mubr.msk.f32.mxu1 %vm4136_vm0, %v4137_v6 }
 0x177   :  { %4040 = vmatprep.subr.bf16.mxu1 %v4135_v3  ;;  %v875_v10 = vmax.f32 %v620_v39, 0.0 }
 0x178   :  { %v624_v62 = vpop.f32.mrb[76].mxu0 }
 0x179   :  { %3742 = vmatmul.mubr.msk.f32.gmra.mrb[56].mxu1 %vm923_vm3, %v866_v22  ;;  %v3514_v0 = vpop.f32.mrb[77].mxu0  ;;  %v625_v42 = vadd.f32 %v4612_v33, %v624_v62 }
 0x17a   :  { %3744 = vmatprep.mubr.msk.f32.mxu1 %vm4136_vm0, %v4137_v6 }
 0x17b   :  { %v876_v45 = vmax.f32 %v625_v42, 0.0 }
 0x17c   :  { %v629_v1 = vpop.f32.mrb[78].mxu0 }
 0x17d   :  { %3745 = vmatmul.mubr.msk.f32.gmra.mrb[58].mxu1 %vm923_vm3, %v867_v63  ;;  %v3517_v8 = vpop.f32.mrb[79].mxu0  ;;  %v630_v46 = vadd.f32 %v4612_v33, %v629_v1 }
 0x17e   :  { %3747 = vmatprep.mubr.msk.f32.mxu1 %vm4136_vm0, %v4137_v6  ;;  %v1791_v8 = vld [vmem:[%s5455_s3 + $0x68] sm:$0xff] }
 0x17f   :  { %v877_v48 = vmax.f32 %v630_v46, 0.0 }
 0x180   :  { %v634_v28 = vpop.f32.mrb[80].mxu0 }
 0x181   :  { %3748 = vmatmul.mubr.msk.f32.gmra.mrb[60].mxu1 %vm923_vm3, %v868_v4  ;;  %v3520_v12 = vpop.f32.mrb[81].mxu0  ;;  %v635_v49 = vadd.f32 %v4612_v33, %v634_v28 }
 0x182   :  { %3750 = vmatprep.mubr.msk.f32.mxu1 %vm4136_vm0, %v4137_v6 }
 0x183   :  { %v878_v16 = vmax.f32 %v635_v49, 0.0  ;;  %v1938_v49 = vld [vmem:[%s5455_s3 + $0x70] sm:$0xff] }
 0x184   :  { %v639_v14 = vpop.f32.mrb[82].mxu0 }
 0x185   :  { %3751 = vmatmul.mubr.msk.f32.gmra.mrb[62].mxu1 %vm923_vm3, %v869_v9  ;;  %v3523_v18 = vpop.f32.mrb[83].mxu0  ;;  %v640_v52 = vadd.f32 %v4612_v33, %v639_v14  ;;  %v4044_v14 = vpack.c.bf16 %v1791_v8, %v1790_v5 }
 0x186   :  { %3753 = vmatprep.mubr.msk.f32.mxu1 %vm4136_vm0, %v4137_v6 }
 0x187   :  { %v879_v55 = vmax.f32 %v640_v52, 0.0 }
 0x188   :  { %v644_v20 = vpop.f32.mrb[84].mxu0 }
 0x189   :  { %3754 = vmatmul.mubr.msk.f32.gmra.mrb[64].mxu1 %vm923_vm3, %v870_v15  ;;  %v3526_v24 = vpop.f32.mrb[85].mxu0  ;;  %v645_v19 = vadd.f32 %v4612_v33, %v644_v20 }
 0x18a   :  { %3756 = vmatprep.mubr.msk.f32.mxu1 %vm4136_vm0, %v4137_v6 }
 0x18b   :  { %v880_v58 = vmax.f32 %v645_v19, 0.0 }
 0x18c   :  { %v649_v26 = vpop.f32.mrb[86].mxu0 }
 0x18d   :  { %3757 = vmatmul.mubr.msk.f32.gmra.mrb[66].mxu1 %vm923_vm3, %v871_v21  ;;  %v3529_v30 = vpop.f32.mrb[87].mxu0  ;;  %v650_v59 = vadd.f32 %v4612_v33, %v649_v26 }
 0x18e   :  { %3759 = vmatprep.mubr.msk.f32.mxu1 %vm4136_vm0, %v4137_v6 }
 0x18f   :  { %v881_v61 = vmax.f32 %v650_v59, 0.0 }
 0x190   :  { %v654_v31 = vpop.f32.mrb[88].mxu0 }
 0x191   :  { %3760 = vmatmul.mubr.msk.f32.gmra.mrb[68].mxu1 %vm923_vm3, %v872_v27  ;;  %v3532_v34 = vpop.f32.mrb[89].mxu0  ;;  %v655_v62 = vadd.f32 %v4612_v33, %v654_v31 }
 0x192   :  { %3762 = vmatprep.mubr.msk.f32.mxu1 %vm4136_vm0, %v4137_v6 }
 0x193   :  { %v882_v0 = vmax.f32 %v655_v62, 0.0 }
 0x194   :  { %v659_v37 = vpop.f32.mrb[90].mxu0 }
 0x195   :  { %3763 = vmatmul.mubr.msk.f32.gmra.mrb[70].mxu1 %vm923_vm3, %v873_v2  ;;  %v3535_v40 = vpop.f32.mrb[91].mxu0  ;;  %v660_v1 = vadd.f32 %v4612_v33, %v659_v37 }
 0x196   :  { %3769 = vmatprep.mubr.msk.f32.mxu1 %vm4136_vm0, %v4137_v6 }
 0x197   :  { %v883_v9 = vmax.f32 %v660_v1, 0.0 }
 0x198   :  { %v664_v41 = vpop.f32.mrb[92].mxu0 }
 0x199   :  { %3770 = vmatmul.mubr.msk.f32.vlgmr.msra.gmra.mrb[72].mxu1 %vm923_vm3, %v874_v38  ;;  %v3538_v43 = vpop.f32.mrb[93].mxu0  ;;  %v665_v11 = vadd.f32 %v4612_v33, %v664_v41 }
 0x19a   :  { %4042 = vmatpush3.bf16.msra.mxu1 %v4041_v7  ;;  %3772 = vmatprep.mubr.msk.f32.mxu1 %vm4136_vm0, %v4137_v6 }
 0x19b   :  { %4043 = vmatprep.subr.bf16.mxu1 %v4135_v3  ;;  %v884_v17 = vmax.f32 %v665_v11, 0.0 }
 0x19c   :  { %v669_v44 = vpop.f32.mrb[94].mxu0 }
 0x19d   :  { %3773 = vmatmul.mubr.msk.f32.gmra.mrb[74].mxu1 %vm923_vm3, %v875_v10  ;;  %v3541_v47 = vpop.f32.mrb[95].mxu0  ;;  %v670_v18 = vadd.f32 %v4612_v33, %v669_v44 }
 0x19e   :  { %3775 = vmatprep.mubr.msk.f32.mxu1 %vm4136_vm0, %v4137_v6 }
 0x19f   :  { %v885_v23 = vmax.f32 %v670_v18, 0.0 }
 0x1a0   :  { %v674_v13 = vpop.f32.mrb[96].mxu0 }
 0x1a1   :  { %3776 = vmatmul.mubr.msk.f32.gmra.mrb[76].mxu1 %vm923_vm3, %v876_v45  ;;  %v3544_v50 = vpop.f32.mrb[97].mxu0  ;;  %v675_v24 = vadd.f32 %v4612_v33, %v674_v13 }
 0x1a2   :  { %3778 = vmatprep.mubr.msk.f32.mxu1 %vm4136_vm0, %v4137_v6  ;;  %v1939_v50 = vld [vmem:[%s5455_s3 + $0x78] sm:$0xff] }
 0x1a3   :  { %v886_v29 = vmax.f32 %v675_v24, 0.0  ;;  %v4047_v19 = vpack.c.bf16 %v1939_v50, %v1938_v49  ;;  %v2087_v49 = vld [vmem:[%s5455_s3 + $0x88] sm:$0xff] }
 0x1a4   :  { %v679_v51 = vpop.f32.mrb[98].mxu0 }
 0x1a5   :  { %3779 = vmatmul.mubr.msk.f32.gmra.mrb[78].mxu1 %vm923_vm3, %v877_v48  ;;  %v3547_v53 = vpop.f32.mrb[99].mxu0  ;;  %v680_v30 = vadd.f32 %v4612_v33, %v679_v51 }
 0x1a6   :  { %3781 = vmatprep.mubr.msk.f32.mxu1 %vm4136_vm0, %v4137_v6 }
 0x1a7   :  { %v887_v32 = vmax.f32 %v680_v30, 0.0 }
 0x1a8   :  { %v684_v54 = vpop.f32.mrb[100].mxu0 }
 0x1a9   :  { %3782 = vmatmul.mubr.msk.f32.gmra.mrb[80].mxu1 %vm923_vm3, %v878_v16  ;;  %v3550_v56 = vpop.f32.mrb[101].mxu0  ;;  %v685_v34 = vadd.f32 %v4612_v33, %v684_v54 }
 0x1aa   :  { %3784 = vmatprep.mubr.msk.f32.mxu1 %vm4136_vm0, %v4137_v6 }
 0x1ab   :  { %v888_v37 = vmax.f32 %v685_v34, 0.0 }
 0x1ac   :  { %v689_v57 = vpop.f32.mrb[102].mxu0 }
 0x1ad   :  { %3785 = vmatmul.mubr.msk.f32.gmra.mrb[82].mxu1 %vm923_vm3, %v879_v55  ;;  %v3553_v22 = vpop.f32.mrb[103].mxu0  ;;  %v690_v38 = vadd.f32 %v4612_v33, %v689_v57 }
 0x1ae   :  { %3787 = vmatprep.mubr.msk.f32.mxu1 %vm4136_vm0, %v4137_v6 }
 0x1af   :  { %v889_v7 = vmax.f32 %v690_v38, 0.0 }
 0x1b0   :  { %v694_v60 = vpop.f32.mrb[104].mxu0 }
 0x1b1   :  { %3788 = vmatmul.mubr.msk.f32.gmra.mrb[84].mxu1 %vm923_vm3, %v880_v58  ;;  %v3556_v63 = vpop.f32.mrb[105].mxu0  ;;  %v695_v41 = vadd.f32 %v4612_v33, %v694_v60 }
 0x1b2   :  { %3790 = vmatprep.mubr.msk.f32.mxu1 %vm4136_vm0, %v4137_v6 }
 0x1b3   :  { %v890_v43 = vmax.f32 %v695_v41, 0.0 }
 0x1b4   :  { %v699_v25 = vpop.f32.mrb[106].mxu0 }
 0x1b5   :  { %3791 = vmatmul.mubr.msk.f32.gmra.mrb[86].mxu1 %vm923_vm3, %v881_v61  ;;  %v3559_v4 = vpop.f32.mrb[107].mxu0  ;;  %v700_v44 = vadd.f32 %v4612_v33, %v699_v25 }
 0x1b6   :  { %3793 = vmatprep.mubr.msk.f32.mxu1 %vm4136_vm0, %v4137_v6 }
 0x1b7   :  { %v891_v47 = vmax.f32 %v700_v44, 0.0 }
 0x1b8   :  { %v704_v28 = vpop.f32.mrb[108].mxu0 }
 0x1b9   :  { %3794 = vmatmul.mubr.msk.f32.gmra.mrb[88].mxu1 %vm923_vm3, %v882_v0  ;;  %v3562_v12 = vpop.f32.mrb[109].mxu0  ;;  %v705_v13 = vadd.f32 %v4612_v33, %v704_v28 }
 0x1ba   :  { %3800 = vmatprep.mubr.msk.f32.mxu1 %vm4136_vm0, %v4137_v6  ;;  %v2261_v12 = vld [vmem:[%s5457_s5 + $0x10] sm:$0xff] }
 0x1bb   :  { %v892_v52 = vmax.f32 %v705_v13, 0.0 }
 0x1bc   :  { %v709_v15 = vpop.f32.mrb[110].mxu0 }
 0x1bd   :  { %3801 = vmatmul.mubr.msk.f32.vlgmr.msra.gmra.mrb[90].mxu1 %vm923_vm3, %v883_v9  ;;  %v3565_v20 = vpop.f32.mrb[111].mxu0  ;;  %v710_v54 = vadd.f32 %v4612_v33, %v709_v15 }
 0x1be   :  { %4045 = vmatpush3.bf16.msra.mxu1 %v4044_v14  ;;  %3803 = vmatprep.mubr.msk.f32.mxu1 %vm4136_vm0, %v4137_v6  ;;  %v2262_v14 = vld [vmem:[%s5457_s5 + $0x18] sm:$0xff] }
 0x1bf   :  { %4046 = vmatprep.subr.bf16.mxu1 %v4135_v3  ;;  %v893_v58 = vmax.f32 %v710_v54, 0.0  ;;  %v4062_v15 = vpack.c.bf16 %v2262_v14, %v2261_v12 }
 0x1c0   :  { %v714_v21 = vpop.f32.mrb[112].mxu0 }
 0x1c1   :  { %3804 = vmatmul.mubr.msk.f32.gmra.mrb[92].mxu1 %vm923_vm3, %v884_v17  ;;  %v3568_v26 = vpop.f32.mrb[113].mxu0  ;;  %v715_v22 = vadd.f32 %v4612_v33, %v714_v21  ;;  %4063 = vmatpush3.bf16.msra.mxu0 %v4062_v15 }
 0x1c2   :  { %3806 = vmatprep.mubr.msk.f32.mxu1 %vm4136_vm0, %v4137_v6  ;;  %4070 = vmatprep.subr.bf16.mxu0 %v4135_v3 }
 0x1c3   :  { %v894_v63 = vmax.f32 %v715_v22, 0.0 }
 0x1c4   :  { %v719_v27 = vpop.f32.mrb[114].mxu0 }
 0x1c5   :  { %3807 = vmatmul.mubr.msk.f32.gmra.mrb[94].mxu1 %vm923_vm3, %v885_v23  ;;  %v3571_v31 = vpop.f32.mrb[115].mxu0  ;;  %v720_v0 = vadd.f32 %v4612_v33, %v719_v27 }
 0x1c6   :  { %3809 = vmatprep.mubr.msk.f32.mxu1 %vm4136_vm0, %v4137_v6 }
 0x1c7   :  { %v895_v8 = vmax.f32 %v720_v0, 0.0 }
 0x1c8   :  { %v4998_v2 = vpop.f32.mrb[116].mxu0 }
 0x1c9   :  { %3810 = vmatmul.mubr.msk.f32.gmra.mrb[96].mxu1 %vm923_vm3, %v886_v29  ;;  %v3574_v35 = vpop.f32.mrb[117].mxu0  ;;  %v725_v9 = vadd.f32 %v4612_v33, %v4998_v2 }
 0x1ca   :  { %3812 = vmatprep.mubr.msk.f32.mxu1 %vm4136_vm0, %v4137_v6 }
 0x1cb   :  { %v896_v20 = vmax.f32 %v725_v9, 0.0 }
 0x1cc   :  { %v5004_v36 = vpop.f32.mrb[118].mxu0 }
 0x1cd   :  { %3813 = vmatmul.mubr.msk.f32.gmra.mrb[98].mxu1 %vm923_vm3, %v887_v32  ;;  %v3577_v39 = vpop.f32.mrb[119].mxu0  ;;  %v730_v23 = vadd.f32 %v4612_v33, %v5004_v36 }
 0x1ce   :  { %3815 = vmatprep.mubr.msk.f32.mxu1 %vm4136_vm0, %v4137_v6 }
 0x1cf   :  { %v897_v29 = vmax.f32 %v730_v23, 0.0 }
 0x1d0   :  { %v5010_v40 = vpop.f32.mrb[120].mxu0 }
 0x1d1   :  { %3816 = vmatmul.mubr.msk.f32.gmra.mrb[100].mxu1 %vm923_vm3, %v888_v37  ;;  %v3580_v10 = vpop.f32.mrb[121].mxu0  ;;  %v735_v31 = vadd.f32 %v4612_v33, %v5010_v40 }
 0x1d2   :  { %3818 = vmatprep.mubr.msk.f32.mxu1 %vm4136_vm0, %v4137_v6 }
 0x1d3   :  { %v898_v35 = vmax.f32 %v735_v31, 0.0 }
 0x1d4   :  { %v5016_v42 = vpop.f32.mrb[122].mxu0 }
 0x1d5   :  { %3819 = vmatmul.mubr.msk.f32.gmra.mrb[102].mxu1 %vm923_vm3, %v889_v7  ;;  %v3583_v45 = vpop.f32.mrb[123].mxu0  ;;  %v740_v37 = vadd.f32 %v4612_v33, %v5016_v42 }
 0x1d6   :  { %3821 = vmatprep.mubr.msk.f32.mxu1 %vm4136_vm0, %v4137_v6 }
 0x1d7   :  { %v899_v7 = vmax.f32 %v740_v37, 0.0 }
 0x1d8   :  { %v5022_v46 = vpop.f32.mrb[124].mxu0 }
 0x1d9   :  { %3822 = vmatmul.mubr.msk.f32.gmra.mrb[104].mxu1 %vm923_vm3, %v890_v43  ;;  %v3586_v48 = vpop.f32.mrb[125].mxu0  ;;  %v745_v10 = vadd.f32 %v4612_v33, %v5022_v46  ;;  %v2086_v46 = vld [vmem:[%s5455_s3 + $0x80] sm:$0xff] }
 0x1da   :  { %3824 = vmatprep.mubr.msk.f32.mxu1 %vm4136_vm0, %v4137_v6 }
 0x1db   :  { %v900_v45 = vmax.f32 %v745_v10, 0.0 }
 0x1dc   :  { %v5034_v51 = vpop.f32.mrb[0].mxu1  ;;  %v5036_v16 = vpop.f32.mrb[126].mxu0 }
 0x1dd   :  { %v3647_v53 = vpop.f32.mrb[1].mxu1  ;;  %3825 = vmatmul.mubr.msk.f32.gmra.mrb[106].mxu1 %vm923_vm3, %v891_v47  ;;  %v3589_v55 = vpop.f32.mrb[127].mxu0  ;;  %v750_v13 = vadd.f32 %v4612_v33, %v5036_v16 }
 0x1de   :  { %3831 = vmatprep.mubr.msk.f32.mxu1 %vm4136_vm0, %v4137_v6 }
 0x1df   :  { %v901_v53 = vmax.f32 %v750_v13, 0.0 }
 0x1e0   :  { %v5042_v56 = vpop.f32.mrb[2].mxu1  ;;  %v5044_v57 = vpop.f32.mrb[128].mxu0 }
 0x1e1   :  { %v3650_v59 = vpop.f32.mrb[3].mxu1  ;;  %3832 = vmatmul.mubr.msk.f32.vlgmr.msra.gmra.mrb[108].mxu1 %vm923_vm3, %v892_v52  ;;  %v3592_v60 = vpop.f32.mrb[129].mxu0  ;;  %v755_v55 = vadd.f32 %v4612_v33, %v5044_v57 }
 0x1e2   :  { %4048 = vmatpush3.bf16.msra.mxu1 %v4047_v19  ;;  %3834 = vmatprep.mubr.msk.f32.mxu1 %vm4136_vm0, %v4137_v6 }
 0x1e3   :  { %4049 = vmatprep.subr.bf16.mxu1 %v4135_v3  ;;  %v902_v60 = vmax.f32 %v755_v55, 0.0 }
 0x1e4   :  { %v5051_v61 = vpop.f32.mrb[4].mxu1  ;;  %v5053_v62 = vpop.f32.mrb[130].mxu0 }
 0x1e5   :  { %v3653_v25 = vpop.f32.mrb[5].mxu1  ;;  %3835 = vmatmul.mubr.msk.f32.gmra.mrb[110].mxu1 %vm923_vm3, %v893_v58  ;;  %v3595_v1 = vpop.f32.mrb[131].mxu0  ;;  %v4050_v58 = vpack.c.bf16 %v2087_v49, %v2086_v46 }
 0x1e6   :  { %3837 = vmatprep.mubr.msk.f32.mxu1 %vm4136_vm0, %v4137_v6  ;;  %v5145_v25 = vld [vmem:[%s5454_s2] ss:$0 sm:$0xff] }
 0x1e7   :  { %v760_v33 = vadd.f32 %v5145_v25, %v5053_v62 }
 0x1e8   :  { %v5059_v4 = vpop.f32.mrb[6].mxu1  ;;  %v5061_v5 = vpop.f32.mrb[132].mxu0 }
 0x1e9   :  { %v3656_v28 = vpop.f32.mrb[7].mxu1  ;;  %3838 = vmatmul.mubr.msk.f32.gmra.mrb[112].mxu1 %vm923_vm3, %v894_v63  ;;  %v3598_v11 = vpop.f32.mrb[133].mxu0  ;;  %v903_v1 = vmax.f32 %v760_v33, 0.0  ;;  %v765_v62 = vadd.f32 %v5145_v25, %v5061_v5 }
 0x1ea   :  { %3840 = vmatprep.mubr.msk.f32.mxu1 %vm4136_vm0, %v4137_v6 }
 0x1eb   :  { %v904_v14 = vmax.f32 %v765_v62, 0.0 }
 0x1ec   :  { %v5074_v17 = vpop.f32.mrb[8].mxu1  ;;  %v5076_v18 = vpop.f32.mrb[134].mxu0 }
 0x1ed   :  { %v3659_v21 = vpop.f32.mrb[9].mxu1  ;;  %3841 = vmatmul.mubr.msk.f32.gmra.mrb[114].mxu1 %vm923_vm3, %v895_v8  ;;  %v3601_v24 = vpop.f32.mrb[135].mxu0 }
 0x1ee   :  { %3843 = vmatprep.mubr.msk.f32.mxu1 %vm4136_vm0, %v4137_v6 }
 0x1f0   :  { %v5084_v26 = vpop.f32.mrb[10].mxu1  ;;  %v5086_v27 = vpop.f32.mrb[136].mxu0 }
 0x1f1   :  { %v3662_v30 = vpop.f32.mrb[11].mxu1  ;;  %3844 = vmatmul.mubr.msk.f32.gmra.mrb[116].mxu1 %vm923_vm3, %v896_v20  ;;  %v3604_v2 = vpop.f32.mrb[137].mxu0 }
 0x1f2   :  { %3846 = vmatprep.mubr.msk.f32.mxu1 %vm4136_vm0, %v4137_v6 }
 0x1f4   :  { %v5093_v32 = vpop.f32.mrb[12].mxu1  ;;  %v5095_v34 = vpop.f32.mrb[138].mxu0 }
 0x1f5   :  { %v3665_v36 = vpop.f32.mrb[13].mxu1  ;;  %3847 = vmatmul.mubr.msk.f32.gmra.mrb[118].mxu1 %vm923_vm3, %v897_v29  ;;  %v3607_v38 = vpop.f32.mrb[139].mxu0 }
 0x1f6   :  { %3849 = vmatprep.mubr.msk.f32.mxu1 %vm4136_vm0, %v4137_v6 }
 0x1f8   :  { %v5102_v39 = vpop.f32.mrb[14].mxu1  ;;  %v5104_v40 = vpop.f32.mrb[140].mxu0 }
 0x1f9   :  { %v3668_v41 = vpop.f32.mrb[15].mxu1  ;;  %3850 = vmatmul.mubr.msk.f32.gmra.mrb[120].mxu1 %vm923_vm3, %v898_v35  ;;  %v3610_v43 = vpop.f32.mrb[141].mxu0 }
 0x1fa   :  { %3852 = vmatprep.mubr.msk.f32.mxu1 %vm4136_vm0, %v4137_v6 }
 0x1fc   :  { %v5111_v42 = vpop.f32.mrb[16].mxu1  ;;  %v5113_v44 = vpop.f32.mrb[142].mxu0 }
 0x1fd   :  { %v3671_v47 = vpop.f32.mrb[17].mxu1  ;;  %3853 = vmatmul.mubr.msk.f32.gmra.mrb[122].mxu1 %vm923_vm3, %v899_v7  ;;  %v3613_v48 = vpop.f32.mrb[143].mxu0 }
 0x1fe   :  { %3855 = vmatprep.mubr.msk.f32.mxu1 %vm4136_vm0, %v4137_v6 }
 0x200   :  { %v1154_v50 = vpop.f32.mrb[18].mxu1  ;;  %v5126_v52 = vpop.f32.mrb[144].mxu0 }
 0x201   :  { %v5129_v54 = vadd.f32 %v1154_v50, %v5034_v51  ;;  %v3678_v16 = vpop.f32.mrb[19].mxu1  ;;  %3856 = vmatmul.mubr.msk.f32.gmra.mrb[124].mxu1 %vm923_vm3, %v900_v45  ;;  %v3616_v19 = vpop.f32.mrb[145].mxu0 }
 0x202   :  { %3862 = vmatprep.mubr.msk.f32.mxu1 %vm4136_vm0, %v4137_v6 }
 0x204   :  { %v1159_v59 = vpop.f32.mrb[20].mxu1  ;;  %v5136_v22 = vpop.f32.mrb[146].mxu0 }
 0x205   :  { %v5139_v63 = vadd.f32 %v1159_v59, %v5042_v56  ;;  %v3681_v51 = vpop.f32.mrb[21].mxu1  ;;  %3863 = vmatmul.mubr.msk.f32.vlgmr.msra.gmra.mrb[126].mxu1 %vm923_vm3, %v901_v53  ;;  %v3619_v57 = vpop.f32.mrb[147].mxu0 }
 0x206   :  { %4051 = vmatpush3.bf16.msra.mxu1 %v4050_v58  ;;  %3865 = vmatprep.mubr.msk.f32.mxu1 %vm4136_vm0, %v4137_v6 }
 0x207   :  { %4052 = vmatprep.subr.bf16.mxu1 %v4135_v3 }
 0x208   :  { %v1164_v56 = vpop.f32.mrb[22].mxu1  ;;  %v5152_v0 = vpop.f32.mrb[148].mxu0 }
 0x209   :  { %v5155_v8 = vadd.f32 %v1164_v56, %v5051_v61  ;;  %v3684_v28 = vpop.f32.mrb[23].mxu1  ;;  %3866 = vmatmul.mubr.msk.f32.gmra.mrb[128].mxu1 %vm923_vm3, %v902_v60  ;;  %v3622_v9 = vpop.f32.mrb[149].mxu0  ;;  %v770_v61 = vadd.f32 %v5145_v25, %v5076_v18  ;;  %v805_v56 = vadd.f32 %v5145_v25, %v5152_v0 }
 0x20a   :  { %3868 = vmatprep.mubr.msk.f32.mxu1 %vm4136_vm0, %v4137_v6 }
 0x20b   :  { %v905_v24 = vmax.f32 %v770_v61, 0.0 }
 0x20c   :  { %v1169_v11 = vpop.f32.mrb[24].mxu1  ;;  %v5162_v12 = vpop.f32.mrb[150].mxu0 }
 0x20d   :  { %v5165_v15 = vadd.f32 %v1169_v11, %v5059_v4  ;;  %v3687_v20 = vpop.f32.mrb[25].mxu1  ;;  %3869 = vmatmul.mubr.msk.f32.gmra.mrb[130].mxu1 %vm923_vm3, %v903_v1  ;;  %v3625_v21 = vpop.f32.mrb[151].mxu0  ;;  %v775_v4 = vadd.f32 %v5145_v25, %v5086_v27  ;;  %v912_v1 = vmax.f32 %v805_v56, 0.0  ;;  %v810_v62 = vadd.f32 %v5145_v25, %v5162_v12 }
 0x20e   :  { %3871 = vmatprep.mubr.msk.f32.mxu1 %vm4136_vm0, %v4137_v6 }
 0x20f   :  { %v906_v35 = vmax.f32 %v775_v4, 0.0  ;;  %v913_v9 = vmax.f32 %v810_v62, 0.0 }
 0x210   :  { %v1174_v5 = vpop.f32.mrb[26].mxu1  ;;  %v5172_v23 = vpop.f32.mrb[152].mxu0 }
 0x211   :  { %v5175_v29 = vadd.f32 %v1174_v5, %v5074_v17  ;;  %v3690_v30 = vpop.f32.mrb[27].mxu1  ;;  %3872 = vmatmul.mubr.msk.f32.gmra.mrb[132].mxu1 %vm923_vm3, %v904_v14  ;;  %v3628_v31 = vpop.f32.mrb[153].mxu0  ;;  %v780_v17 = vadd.f32 %v5145_v25, %v5095_v34  ;;  %v815_v14 = vadd.f32 %v5145_v25, %v5172_v23 }
 0x212   :  { %3874 = vmatprep.mubr.msk.f32.mxu1 %vm4136_vm0, %v4137_v6 }
 0x213   :  { %v907_v41 = vmax.f32 %v780_v17, 0.0  ;;  %v914_v20 = vmax.f32 %v815_v14, 0.0 }
 0x214   :  { %v1179_v18 = vpop.f32.mrb[28].mxu1  ;;  %v5182_v2 = vpop.f32.mrb[154].mxu0 }
 0x215   :  { %v5185_v36 = vadd.f32 %v1179_v18, %v5084_v26  ;;  %v3693_v37 = vpop.f32.mrb[29].mxu1  ;;  %3875 = vmatmul.mubr.msk.f32.gmra.mrb[134].mxu1 %vm923_vm3, %v905_v24  ;;  %v3631_v38 = vpop.f32.mrb[155].mxu0  ;;  %v785_v26 = vadd.f32 %v5145_v25, %v5104_v40  ;;  %v820_v21 = vadd.f32 %v5145_v25, %v5182_v2 }
 0x216   :  { %3877 = vmatprep.mubr.msk.f32.mxu1 %vm4136_vm0, %v4137_v6 }
 0x217   :  { %v908_v13 = vmax.f32 %v785_v26, 0.0  ;;  %v915_v5 = vmax.f32 %v820_v21, 0.0 }
 0x218   :  { %v1184_v27 = vpop.f32.mrb[30].mxu1  ;;  %v5192_v7 = vpop.f32.mrb[156].mxu0 }
 0x219   :  { %v5195_v10 = vadd.f32 %v1184_v27, %v5093_v32  ;;  %v3696_v43 = vpop.f32.mrb[31].mxu1  ;;  %3878 = vmatmul.mubr.msk.f32.gmra.mrb[136].mxu1 %vm923_vm3, %v906_v35  ;;  %v3634_v45 = vpop.f32.mrb[157].mxu0  ;;  %v790_v32 = vadd.f32 %v5145_v25, %v5113_v44  ;;  %v825_v30 = vadd.f32 %v5145_v25, %v5192_v7 }
 0x21a   :  { %3880 = vmatprep.mubr.msk.f32.mxu1 %vm4136_vm0, %v4137_v6 }
 0x21b   :  { %v909_v53 = vmax.f32 %v790_v32, 0.0  ;;  %v916_v4 = vmax.f32 %v825_v30, 0.0 }
 0x21c   :  { %v1189_v34 = vpop.f32.mrb[32].mxu1  ;;  %v5202_v47 = vpop.f32.mrb[158].mxu0 }
 0x21d   :  { %v5205_v48 = vadd.f32 %v1189_v34, %v5102_v39  ;;  %v3699_v46 = vpop.f32.mrb[33].mxu1  ;;  %3881 = vmatmul.mubr.msk.f32.gmra.mrb[138].mxu1 %vm923_vm3, %v907_v41  ;;  %v3637_v49 = vpop.f32.mrb[159].mxu0  ;;  %v795_v39 = vadd.f32 %v5145_v25, %v5126_v52  ;;  %v830_v2 = vadd.f32 %v5145_v25, %v5202_v47 }
 0x21e   :  { %3883 = vmatprep.mubr.msk.f32.mxu1 %vm4136_vm0, %v4137_v6 }
 0x21f   :  { %v910_v58 = vmax.f32 %v795_v39, 0.0 }
 0x220   :  { %v1194_v40 = vpop.f32.mrb[34].mxu1  ;;  %v834_v50 = vpop.f32.mrb[160].mxu0 }
 0x221   :  { %v5213_v16 = vadd.f32 %v1194_v40, %v5111_v42  ;;  %v3702_v55 = vpop.f32.mrb[35].mxu1  ;;  %3884 = vmatmul.mubr.msk.f32.gmra.mrb[140].mxu1 %vm923_vm3, %v908_v13  ;;  %v3640_v19 = vpop.f32.mrb[161].mxu0  ;;  %v800_v42 = vadd.f32 %v5145_v25, %v5136_v22  ;;  %v835_v38 = vadd.f32 %v5145_v25, %v834_v50 }
 0x222   :  { %3886 = vmatprep.mubr.msk.f32.mxu1 %vm4136_vm0, %v4137_v6 }
 0x223   :  { %v911_v33 = vmax.f32 %v800_v42, 0.0  ;;  %v918_v7 = vmax.f32 %v835_v38, 0.0  ;;  %v2264_v42 = vld [vmem:[%s5457_s5 + $0x28] sm:$0xff] }
 0x224   :  { %v1293_v44 = vpop.f32.mrb[36].mxu1 }
 0x225   :  { %v1337_v59 = vadd.f32 %v1293_v44, %v5129_v54  ;;  %v3709_v60 = vpop.f32.mrb[37].mxu1  ;;  %3887 = vmatmul.mubr.msk.f32.gmra.mrb[142].mxu1 %vm923_vm3, %v909_v53 }
 0x226   :  { %3893 = vmatprep.mubr.msk.f32.mxu1 %vm4136_vm0, %v4137_v6  ;;  %v2263_v60 = vld [vmem:[%s5457_s5 + $0x20] sm:$0xff] }
 0x228   :  { %v1298_v51 = vpop.f32.mrb[38].mxu1 }
 0x229   :  { %v1338_v52 = vadd.f32 %v1298_v51, %v5139_v63  ;;  %v3712_v57 = vpop.f32.mrb[39].mxu1  ;;  %3894 = vmatmul.mubr.msk.f32.vlgmr.msra.gmra.mrb[144].mxu1 %vm923_vm3, %v910_v58  ;;  %v4053_v51 = vpack.c.bf16 %v2264_v42, %v2263_v60 }
 0x22a   :  { %3896 = vmatprep.mubr.msk.f32.mxu1 %vm4136_vm0, %v4137_v6 }
 0x22b   :  { %4054 = vmatpush3.bf16.msra.mxu1 %v4053_v51 }
 0x22c   :  { %v1303_v54 = vpop.f32.mrb[40].mxu1  ;;  %4055 = vmatprep.subr.bf16.mxu1 %v4135_v3 }
 0x22d   :  { %v1339_v22 = vadd.f32 %v1303_v54, %v5155_v8  ;;  %v3715_v28 = vpop.f32.mrb[41].mxu1  ;;  %3897 = vmatmul.mubr.msk.f32.gmra.mrb[146].mxu1 %vm923_vm3, %v911_v33 }
 0x22e   :  { %3899 = vmatprep.mubr.msk.f32.mxu1 %vm4136_vm0, %v4137_v6 }
 0x230   :  { %v1308_v63 = vpop.f32.mrb[42].mxu1 }
 0x231   :  { %v1340_v0 = vadd.f32 %v1308_v63, %v5165_v15  ;;  %v3718_v11 = vpop.f32.mrb[43].mxu1  ;;  %3900 = vmatmul.mubr.msk.f32.gmra.mrb[148].mxu1 %vm923_vm3, %v912_v1 }
 0x232   :  { %3902 = vmatprep.mubr.msk.f32.mxu1 %vm4136_vm0, %v4137_v6 }
 0x234   :  { %v1313_v8 = vpop.f32.mrb[44].mxu1 }
 0x235   :  { %v1341_v12 = vadd.f32 %v1313_v8, %v5175_v29  ;;  %v3721_v61 = vpop.f32.mrb[45].mxu1  ;;  %3903 = vmatmul.mubr.msk.f32.gmra.mrb[150].mxu1 %vm923_vm3, %v913_v9 }
 0x236   :  { %3905 = vmatprep.mubr.msk.f32.mxu1 %vm4136_vm0, %v4137_v6 }
 0x238   :  { %v1318_v15 = vpop.f32.mrb[46].mxu1 }
 0x239   :  { %v1342_v23 = vadd.f32 %v1318_v15, %v5185_v36  ;;  %v3724_v24 = vpop.f32.mrb[47].mxu1  ;;  %3906 = vmatmul.mubr.msk.f32.gmra.mrb[152].mxu1 %vm923_vm3, %v914_v20  ;;  %v917_v36 = vmax.f32 %v830_v2, 0.0  ;;  %v2265_v20 = vld [vmem:[%s5457_s5 + $0x30] sm:$0xff] }
 0x23a   :  { %3908 = vmatprep.mubr.msk.f32.mxu1 %vm4136_vm0, %v4137_v6 }
 0x23c   :  { %v1323_v29 = vpop.f32.mrb[48].mxu1 }
 0x23d   :  { %v1343_v31 = vadd.f32 %v1323_v29, %v5195_v10  ;;  %v3727_v18 = vpop.f32.mrb[49].mxu1  ;;  %3909 = vmatmul.mubr.msk.f32.gmra.mrb[154].mxu1 %vm923_vm3, %v915_v5 }
 0x23e   :  { %3911 = vmatprep.mubr.msk.f32.mxu1 %vm4136_vm0, %v4137_v6 }
 0x240   :  { %v1328_v35 = vpop.f32.mrb[50].mxu1 }
 0x241   :  { %v1344_v37 = vadd.f32 %v1328_v35, %v5205_v48  ;;  %v3730_v17 = vpop.f32.mrb[51].mxu1  ;;  %3912 = vmatmul.mubr.msk.f32.gmra.mrb[156].mxu1 %vm923_vm3, %v916_v4 }
 0x242   :  { %3914 = vmatprep.mubr.msk.f32.mxu1 %vm4136_vm0, %v4137_v6 }
 0x244   :  { %v1333_v27 = vpop.f32.mrb[52].mxu1 }
 0x245   :  { %v1345_v41 = vadd.f32 %v1333_v27, %v5213_v16  ;;  %v3733_v10 = vpop.f32.mrb[53].mxu1  ;;  %3915 = vmatmul.mubr.msk.f32.gmra.mrb[158].mxu1 %vm923_vm3, %v917_v36 }
 0x246   :  { %3917 = vmatprep.mubr.msk.f32.mxu1 %vm4136_vm0, %v4137_v6 }
 0x248   :  { %v1441_v43 = vpop.f32.mrb[54].mxu1 }
 0x249   :  { %v1485_v26 = vadd.f32 %v1441_v43, %v1337_v59  ;;  %v3740_v45 = vpop.f32.mrb[55].mxu1  ;;  %3918 = vmatmul.mubr.msk.f32.gmra.mrb[160].mxu1 %vm923_vm3, %v918_v7 }
 0x24a   :  { %3928 = vmatprep.mubr.msk.f32.mxu1 %vm4136_vm0, %v4137_v6 }
 0x24c   :  { %v1446_v25 = vpop.f32.mrb[56].mxu1 }
 0x24d   :  { %v1486_v34 = vadd.f32 %v1446_v25, %v1338_v52  ;;  %v3743_v47 = vpop.f32.mrb[57].mxu1 }
 0x250   :  { %v1451_v13 = vpop.f32.mrb[58].mxu1 }
 0x251   :  { %v1487_v48 = vadd.f32 %v1451_v13, %v1339_v22  ;;  %v3746_v46 = vpop.f32.mrb[59].mxu1 }
 0x254   :  { %v1456_v32 = vpop.f32.mrb[60].mxu1 }
 0x255   :  { %v1488_v49 = vadd.f32 %v1456_v32, %v1340_v0  ;;  %v3749_v40 = vpop.f32.mrb[61].mxu1 }
 0x258   :  { %v1461_v50 = vpop.f32.mrb[62].mxu1 }
 0x259   :  { %v1489_v53 = vadd.f32 %v1461_v50, %v1341_v12  ;;  %v3752_v16 = vpop.f32.mrb[63].mxu1  ;;  %v2266_v12 = vld [vmem:[%s5457_s5 + $0x38] sm:$0xff] }
 0x25a   :  { %v4056_v61 = vpack.c.bf16 %v2266_v12, %v2265_v20 }
 0x25c   :  { %v1466_v55 = vpop.f32.mrb[64].mxu1  ;;  %4057 = vmatpush3.bf16.msra.mxu1 %v4056_v61 }
 0x25d   :  { %v1490_v39 = vadd.f32 %v1466_v55, %v1342_v23  ;;  %v3755_v19 = vpop.f32.mrb[65].mxu1  ;;  %4064 = vmatprep.subr.bf16.mxu1 %v4135_v3 }
 0x260   :  { %v1471_v44 = vpop.f32.mrb[66].mxu1 }
 0x261   :  { %v1491_v58 = vadd.f32 %v1471_v44, %v1343_v31  ;;  %v3758_v59 = vpop.f32.mrb[67].mxu1 }
 0x264   :  { %v1476_v33 = vpop.f32.mrb[68].mxu1 }
 0x265   :  { %v1492_v52 = vadd.f32 %v1476_v33, %v1344_v37  ;;  %v3761_v57 = vpop.f32.mrb[69].mxu1 }
 0x268   :  { %v1481_v56 = vpop.f32.mrb[70].mxu1 }
 0x269   :  { %v1493_v54 = vadd.f32 %v1481_v56, %v1345_v41  ;;  %v3764_v1 = vpop.f32.mrb[71].mxu1 }
 0x26c   :  { %v1589_v22 = vpop.f32.mrb[72].mxu1 }
 0x26d   :  { %v1633_v28 = vadd.f32 %v1589_v22, %v1485_v26  ;;  %v3771_v62 = vpop.f32.mrb[73].mxu1 }
 0x270   :  { %v1594_v63 = vpop.f32.mrb[74].mxu1 }
 0x271   :  { %v1634_v9 = vadd.f32 %v1594_v63, %v1486_v34  ;;  %v3774_v0 = vpop.f32.mrb[75].mxu1 }
 0x274   :  { %v1599_v11 = vpop.f32.mrb[76].mxu1 }
 0x275   :  { %v1635_v14 = vadd.f32 %v1599_v11, %v1487_v48  ;;  %v3777_v8 = vpop.f32.mrb[77].mxu1 }
 0x278   :  { %v1604_v21 = vpop.f32.mrb[78].mxu1 }
 0x279   :  { %v1636_v15 = vadd.f32 %v1604_v21, %v1488_v49  ;;  %v3780_v5 = vpop.f32.mrb[79].mxu1 }
 0x27c   :  { %v1609_v23 = vpop.f32.mrb[80].mxu1 }
 0x27d   :  { %v1637_v24 = vadd.f32 %v1609_v23, %v1489_v53  ;;  %v3783_v30 = vpop.f32.mrb[81].mxu1 }
 0x280   :  { %v1614_v29 = vpop.f32.mrb[82].mxu1 }
 0x281   :  { %v1638_v4 = vadd.f32 %v1614_v29, %v1490_v39  ;;  %v3786_v31 = vpop.f32.mrb[83].mxu1 }
 0x284   :  { %v1619_v18 = vpop.f32.mrb[84].mxu1 }
 0x285   :  { %v1639_v2 = vadd.f32 %v1619_v18, %v1491_v58  ;;  %v3789_v35 = vpop.f32.mrb[85].mxu1 }
 0x288   :  { %v1624_v36 = vpop.f32.mrb[86].mxu1 }
 0x289   :  { %v1640_v37 = vadd.f32 %v1624_v36, %v1492_v52  ;;  %v3792_v17 = vpop.f32.mrb[87].mxu1 }
 0x28c   :  { %v1629_v38 = vpop.f32.mrb[88].mxu1 }
 0x28d   :  { %v1641_v27 = vadd.f32 %v1629_v38, %v1493_v54  ;;  %v3795_v7 = vpop.f32.mrb[89].mxu1 }
 0x290   :  { %v1737_v41 = vpop.f32.mrb[90].mxu1 }
 0x291   :  { %v1781_v10 = vadd.f32 %v1737_v41, %v1633_v28  ;;  %v3802_v43 = vpop.f32.mrb[91].mxu1 }
 0x294   :  { %v1742_v26 = vpop.f32.mrb[92].mxu1 }
 0x295   :  { %v1782_v45 = vadd.f32 %v1742_v26, %v1634_v9  ;;  %v3805_v25 = vpop.f32.mrb[93].mxu1 }
 0x298   :  { %v1747_v34 = vpop.f32.mrb[94].mxu1 }
 0x299   :  { %v1783_v47 = vadd.f32 %v1747_v34, %v1635_v14  ;;  %v3808_v13 = vpop.f32.mrb[95].mxu1 }
 0x29c   :  { %v1752_v48 = vpop.f32.mrb[96].mxu1 }
 0x29d   :  { %v1784_v46 = vadd.f32 %v1752_v48, %v1636_v15  ;;  %v3811_v32 = vpop.f32.mrb[97].mxu1 }
 0x2a0   :  { %v1757_v49 = vpop.f32.mrb[98].mxu1 }
 0x2a1   :  { %v1785_v40 = vadd.f32 %v1757_v49, %v1637_v24  ;;  %v3814_v50 = vpop.f32.mrb[99].mxu1 }
 0x2a4   :  { %v1762_v53 = vpop.f32.mrb[100].mxu1 }
 0x2a5   :  { %v1786_v16 = vadd.f32 %v1762_v53, %v1638_v4  ;;  %v3817_v55 = vpop.f32.mrb[101].mxu1 }
 0x2a8   :  { %v1767_v39 = vpop.f32.mrb[102].mxu1 }
 0x2a9   :  { %v1787_v19 = vadd.f32 %v1767_v39, %v1639_v2  ;;  %v3820_v44 = vpop.f32.mrb[103].mxu1 }
 0x2aa   :  { %v5301_v44 = vld [vmem:[%s5456_s4] ss:$0 sm:$0xff] }
 0x2ac   :  { %v1772_v58 = vpop.f32.mrb[104].mxu1 }
 0x2ad   :  { %v1788_v59 = vadd.f32 %v1772_v58, %v1640_v37  ;;  %v3823_v60 = vpop.f32.mrb[105].mxu1 }
 0x2ae   :  { %v2492_v60 = vld [vmem:[%s5457_s5 + $0x60] sm:$0xff] }
 0x2b0   :  { %v1777_v42 = vpop.f32.mrb[106].mxu1 }
 0x2b1   :  { %v1789_v51 = vadd.f32 %v1777_v42, %v1641_v27  ;;  %v3826_v33 = vpop.f32.mrb[107].mxu1  ;;  %v2493_v42 = vld [vmem:[%s5457_s5 + $0x68] sm:$0xff] }
 0x2b4   :  { %v1885_v52 = vpop.f32.mrb[108].mxu1 }
 0x2b5   :  { %v1929_v57 = vadd.f32 %v1885_v52, %v1781_v10  ;;  %v3833_v56 = vpop.f32.mrb[109].mxu1  ;;  %v2414_v52 = vld [vmem:[%s5457_s5 + $0x40] sm:$0xff] }
 0x2b8   :  { %v1890_v54 = vpop.f32.mrb[110].mxu1 }
 0x2b9   :  { %v1930_v1 = vadd.f32 %v1890_v54, %v1782_v45  ;;  %v3836_v22 = vpop.f32.mrb[111].mxu1 }
 0x2ba   :  { %v2415_v22 = vld [vmem:[%s5457_s5 + $0x48] sm:$0xff] }
 0x2bc   :  { %v1895_v28 = vpop.f32.mrb[112].mxu1 }
 0x2bd   :  { %v1931_v62 = vadd.f32 %v1895_v28, %v1783_v47  ;;  %v3839_v63 = vpop.f32.mrb[113].mxu1  ;;  %v2494_v28 = vld [vmem:[%s5457_s5 + $0x70] sm:$0xff] }
 0x2c0   :  { %v1900_v9 = vpop.f32.mrb[114].mxu1 }
 0x2c1   :  { %v1932_v0 = vadd.f32 %v1900_v9, %v1784_v46  ;;  %v3842_v11 = vpop.f32.mrb[115].mxu1 }
 0x2c4   :  { %v1905_v14 = vpop.f32.mrb[116].mxu1 }
 0x2c5   :  { %v1933_v8 = vadd.f32 %v1905_v14, %v1785_v40  ;;  %v3845_v20 = vpop.f32.mrb[117].mxu1 }
 0x2c8   :  { %v1910_v12 = vpop.f32.mrb[118].mxu1 }
 0x2c9   :  { %v1934_v61 = vadd.f32 %v1910_v12, %v1786_v16  ;;  %v3848_v21 = vpop.f32.mrb[119].mxu1  ;;  %v2416_v12 = vld [vmem:[%s5457_s5 + $0x50] sm:$0xff] }
 0x2cc   :  { %v1915_v15 = vpop.f32.mrb[120].mxu1 }
 0x2cd   :  { %v1935_v5 = vadd.f32 %v1915_v15, %v1787_v19  ;;  %v3851_v23 = vpop.f32.mrb[121].mxu1 }
 0x2d0   :  { %v1920_v24 = vpop.f32.mrb[122].mxu1 }
 0x2d1   :  { %v1936_v30 = vadd.f32 %v1920_v24, %v1788_v59  ;;  %v3854_v29 = vpop.f32.mrb[123].mxu1 }
 0x2d2   :  { %v2571_v29 = vld [vmem:[%s5457_s5 + $0x88] sm:$0xff] }
 0x2d4   :  { %v1925_v4 = vpop.f32.mrb[124].mxu1 }
 0x2d5   :  { %v1937_v31 = vadd.f32 %v1925_v4, %v1789_v51  ;;  %v3857_v18 = vpop.f32.mrb[125].mxu1  ;;  %v2648_v4 = vld [vmem:[%s5457_s5 + $0xa0] sm:$0xff] }
 0x2d8   :  { %v2033_v2 = vpop.f32.mrb[126].mxu1 }
 0x2d9   :  { %v2077_v35 = vadd.f32 %v2033_v2, %v1929_v57  ;;  %v3864_v36 = vpop.f32.mrb[127].mxu1  ;;  %v4071_v57 = vpack.c.bf16 %v2493_v42, %v2492_v60 }
 0x2dc   :  { %v2038_v37 = vpop.f32.mrb[128].mxu1 }
 0x2dd   :  { %v2078_v17 = vadd.f32 %v2038_v37, %v1930_v1  ;;  %v3867_v38 = vpop.f32.mrb[129].mxu1  ;;  %v2572_v37 = vld [vmem:[%s5457_s5 + $0x90] sm:$0xff] }
 0x2e0   :  { %v2043_v27 = vpop.f32.mrb[130].mxu1 }
 0x2e1   :  { %v2079_v7 = vadd.f32 %v2043_v27, %v1931_v62  ;;  %v3870_v41 = vpop.f32.mrb[131].mxu1  ;;  %v2495_v62 = vld [vmem:[%s5457_s5 + $0x78] sm:$0xff] }
 0x2e2   :  { %v4074_v11 = vpack.c.bf16 %v2495_v62, %v2494_v28  ;;  %v2573_v41 = vld [vmem:[%s5457_s5 + $0x98] sm:$0xff]  ;;  %v2882_v62 = vld [vmem:[%s5457_s5 + $0x100] sm:$0xff] }
 0x2e4   :  { %v2048_v10 = vpop.f32.mrb[132].mxu1 }
 0x2e5   :  { %v2080_v43 = vadd.f32 %v2048_v10, %v1932_v0  ;;  %v3873_v26 = vpop.f32.mrb[133].mxu1  ;;  %v4065_v0 = vpack.c.bf16 %v2415_v22, %v2414_v52  ;;  %v2650_v10 = vld [vmem:[%s5457_s5 + $0xb0] sm:$0xff] }
 0x2e6   :  { %v2806_v52 = vld [vmem:[%s5457_s5 + $0xf0] sm:$0xff] }
 0x2e8   :  { %v2053_v45 = vpop.f32.mrb[134].mxu1 }
 0x2e9   :  { %v5288_v25 = vadd.f32 %v2053_v45, %v1933_v8  ;;  %v3876_v34 = vpop.f32.mrb[135].mxu1  ;;  %v4080_v45 = vpack.c.bf16 %v2573_v41, %v2572_v37 }
 0x2ea   :  { %v2726_v34 = vld [vmem:[%s5457_s5 + $0xc0] sm:$0xff] }
 0x2ec   :  { %v2058_v47 = vpop.f32.mrb[136].mxu1 }
 0x2ed   :  { %v5290_v13 = vadd.f32 %v2058_v47, %v1934_v61  ;;  %v3879_v48 = vpop.f32.mrb[137].mxu1  ;;  %v2417_v61 = vld [vmem:[%s5457_s5 + $0x58] sm:$0xff] }
 0x2ee   :  { %v4068_v15 = vpack.c.bf16 %v2417_v61, %v2416_v12  ;;  %v2884_v12 = vld [vmem:[%s5457_s5 + $0x110] sm:$0xff]  ;;  %v2885_v61 = vld [vmem:[%s5457_s5 + $0x118] sm:$0xff] }
 0x2f0   :  { %v2063_v46 = vpop.f32.mrb[138].mxu1 }
 0x2f1   :  { %v5292_v32 = vadd.f32 %v2063_v46, %v1935_v5  ;;  %v3882_v49 = vpop.f32.mrb[139].mxu1  ;;  %v2570_v5 = vld [vmem:[%s5457_s5 + $0x80] sm:$0xff] }
 0x2f2   :  { %v2727_v49 = vld [vmem:[%s5457_s5 + $0xc8] sm:$0xff] }
 0x2f4   :  { %v2068_v40 = vpop.f32.mrb[140].mxu1 }
 0x2f5   :  { %v5294_v50 = vadd.f32 %v2068_v40, %v1936_v30  ;;  %v3885_v53 = vpop.f32.mrb[141].mxu1  ;;  %v2804_v40 = vld [vmem:[%s5457_s5 + $0xe0] sm:$0xff] }
 0x2f6   :  { %v2805_v53 = vld [vmem:[%s5457_s5 + $0xe8] sm:$0xff] }
 0x2f8   :  { %v2073_v16 = vpop.f32.mrb[142].mxu1 }
 0x2f9   :  { %v5296_v55 = vadd.f32 %v2073_v16, %v1937_v31  ;;  %v3888_v39 = vpop.f32.mrb[143].mxu1  ;;  %v2649_v31 = vld [vmem:[%s5457_s5 + $0xa8] sm:$0xff] }
 0x2fa   :  { %v4083_v36 = vpack.c.bf16 %v2649_v31, %v2648_v4  ;;  %v4089_v39 = vpack.c.bf16 %v2727_v49, %v2726_v34 }
 0x2fc   :  { %v2181_v19 = vpop.f32.mrb[144].mxu1 }
 0x2fd   :  { %v2225_v58 = vadd.f32 %v2181_v19, %v2077_v35  ;;  %v3895_v59 = vpop.f32.mrb[145].mxu1  ;;  %v4077_v35 = vpack.c.bf16 %v2571_v29, %v2570_v5  ;;  %v4095_v19 = vpack.c.bf16 %v2805_v53, %v2804_v40 }
 0x2ff   :  { %v2241_v51 = vadd.f32 %v5301_v44, %v2225_v58  ;;  %v2728_v58 = vld [vmem:[%s5457_s5 + $0xd0] sm:$0xff] }
 0x300   :  { %v2186_v33 = vpop.f32.mrb[146].mxu1 }
 0x301   :  { %v2250_v56 = vmax.f32 %v2241_v51, 0.0  ;;  %v2226_v54 = vadd.f32 %v2186_v33, %v2078_v17  ;;  %v3898_v1 = vpop.f32.mrb[147].mxu1  ;;  %v2729_v33 = vld [vmem:[%s5457_s5 + $0xd8] sm:$0xff] }
 0x303   :  { %v2242_v63 = vadd.f32 %v5301_v44, %v2226_v54  ;;  %3940 = vmatmul.mubr.msk.f32.vlgmr.msra.gmra.mrb[162].mxu0 %vm2267_vm4, %v2250_v56  ;;  %v4092_v56 = vpack.c.bf16 %v2729_v33, %v2728_v58 }
 0x304   :  { %v2191_v9 = vpop.f32.mrb[148].mxu1  ;;  %4072 = vmatpush3.bf16.msra.mxu0 %v4071_v57  ;;  %3961 = vmatprep.mubr.msk.f32.mxu0 %vm4136_vm0, %v4137_v6  ;;  %v2807_v57 = vld [vmem:[%s5457_s5 + $0xf8] sm:$0xff] }
 0x305   :  { %v2251_v14 = vmax.f32 %v2242_v63, 0.0  ;;  %v2227_v8 = vadd.f32 %v2191_v9, %v2079_v7  ;;  %v3901_v20 = vpop.f32.mrb[149].mxu1  ;;  %4073 = vmatprep.subr.bf16.mxu0 %v4135_v3  ;;  %v4098_v54 = vpack.c.bf16 %v2807_v57, %v2806_v52  ;;  %v2883_v63 = vld [vmem:[%s5457_s5 + $0x108] sm:$0xff] }
 0x307   :  { %3929 = vmatmul.mubr.msk.f32.vlgmr.msra.gmra.mrb[162].mxu1 %vm2267_vm4, %v2251_v14  ;;  %v2243_v23 = vadd.f32 %v5301_v44, %v2227_v8 }
 0x308   :  { %4066 = vmatpush3.bf16.msra.mxu1 %v4065_v0  ;;  %v2196_v21 = vpop.f32.mrb[150].mxu1  ;;  %4075 = vmatpush3.bf16.msra.mxu0 %v4074_v11  ;;  %v4101_v0 = vpack.c.bf16 %v2883_v63, %v2882_v62 }
 0x309   :  { %v2228_v24 = vadd.f32 %v2196_v21, %v2080_v43  ;;  %4067 = vmatprep.subr.bf16.mxu1 %v4135_v3  ;;  %v3904_v30 = vpop.f32.mrb[151].mxu1  ;;  %3950 = vmatprep.mubr.msk.f32.mxu1 %vm4136_vm0, %v4137_v6  ;;  %v2252_v17 = vmax.f32 %v2243_v23, 0.0  ;;  %v2651_v43 = vld [vmem:[%s5457_s5 + $0xb8] sm:$0xff]  ;;  %v4104_v21 = vpack.c.bf16 %v2885_v61, %v2884_v12 }
 0x30a   :  { %4082 = vmatprep.subr.bf16.mxu0 %v4135_v3 }
 0x30b   :  { %v2244_v18 = vadd.f32 %v5301_v44, %v2228_v24 }
 0x30c   :  { %4069 = vmatpush3.bf16.msra.mxu1 %v4068_v15  ;;  %v2201_v2 = vpop.f32.mrb[152].mxu1 }
 0x30d   :  { %v2253_v38 = vmax.f32 %v2244_v18, 0.0  ;;  %v2229_v27 = vadd.f32 %v2201_v2, %v5288_v25  ;;  %4076 = vmatprep.subr.bf16.mxu1 %v4135_v3  ;;  %v3907_v7 = vpop.f32.mrb[153].mxu1  ;;  %v4086_v25 = vpack.c.bf16 %v2651_v43, %v2650_v10 }
 0x30f   :  { %3951 = vmatmul.mubr.msk.f32.vlgmr.msra.gmra.mrb[164].mxu1 %vm2267_vm4, %v2252_v17  ;;  %3962 = vmatmul.mubr.msk.f32.vlgmr.msra.gmra.mrb[164].mxu0 %vm2267_vm4, %v2253_v38  ;;  %v2245_v47 = vadd.f32 %v5301_v44, %v2229_v27 }
 0x310   :  { %4078 = vmatpush3.bf16.msra.mxu1 %v4077_v35  ;;  %v2206_v26 = vpop.f32.mrb[154].mxu1  ;;  %4084 = vmatpush3.bf16.msra.mxu0 %v4083_v36 }
 0x311   :  { %v2230_v48 = vadd.f32 %v2206_v26, %v5290_v13  ;;  %4079 = vmatprep.subr.bf16.mxu1 %v4135_v3  ;;  %v3910_v46 = vpop.f32.mrb[155].mxu1  ;;  %4085 = vmatprep.subr.bf16.mxu0 %v4135_v3  ;;  %v2254_v59 = vmax.f32 %v2245_v47, 0.0 }
 0x312   :  { %3972 = vmatprep.mubr.msk.f32.mxu1 %vm4136_vm0, %v4137_v6  ;;  %3983 = vmatprep.mubr.msk.f32.mxu0 %vm4136_vm0, %v4137_v6 }
 0x313   :  { %v2246_v13 = vadd.f32 %v5301_v44, %v2230_v48 }
 0x314   :  { %4081 = vmatpush3.bf16.msra.mxu1 %v4080_v45  ;;  %v2211_v16 = vpop.f32.mrb[156].mxu1  ;;  %4087 = vmatpush3.bf16.msra.mxu0 %v4086_v25  ;;  %v3157_v25 = vld [vmem:[%s5458_s6] ss:$0 sm:$0xff] }
 0x315   :  { %v2255_v60 = vmax.f32 %v2246_v13, 0.0  ;;  %v2231_v42 = vadd.f32 %v2211_v16, %v5292_v32  ;;  %4088 = vmatprep.subr.bf16.mxu1 %v4135_v3  ;;  %v3913_v51 = vpop.f32.mrb[157].mxu1  ;;  %4094 = vmatprep.subr.bf16.mxu0 %v4135_v3 }
 0x317   :  { %3973 = vmatmul.mubr.msk.f32.vlgmr.msra.gmra.mrb[166].mxu1 %vm2267_vm4, %v2254_v59  ;;  %3984 = vmatmul.mubr.msk.f32.vlgmr.msra.gmra.mrb[166].mxu0 %vm2267_vm4, %v2255_v60  ;;  %v2247_v1 = vadd.f32 %v5301_v44, %v2231_v42 }
 0x318   :  { %4090 = vmatpush3.bf16.msra.mxu1 %v4089_v39  ;;  %v2216_v32 = vpop.f32.mrb[158].mxu1  ;;  %4096 = vmatpush3.bf16.msra.mxu0 %v4095_v19 }
 0x319   :  { %v2232_v22 = vadd.f32 %v2216_v32, %v5294_v50  ;;  %4091 = vmatprep.subr.bf16.mxu1 %v4135_v3  ;;  %v3916_v28 = vpop.f32.mrb[159].mxu1  ;;  %4097 = vmatprep.subr.bf16.mxu0 %v4135_v3  ;;  %v2256_v11 = vmax.f32 %v2247_v1, 0.0 }
 0x31a   :  { %3994 = vmatprep.mubr.msk.f32.mxu1 %vm4136_vm0, %v4137_v6  ;;  %4005 = vmatprep.mubr.msk.f32.mxu0 %vm4136_vm0, %v4137_v6 }
 0x31b   :  { %v2248_v50 = vadd.f32 %v5301_v44, %v2232_v22 }
 0x31c   :  { %4093 = vmatpush3.bf16.msra.mxu1 %v4092_v56  ;;  %v2221_v9 = vpop.f32.mrb[160].mxu1  ;;  %4099 = vmatpush3.bf16.msra.mxu0 %v4098_v54 }
 0x31d   :  { %v2257_v14 = vmax.f32 %v2248_v50, 0.0  ;;  %v2233_v8 = vadd.f32 %v2221_v9, %v5296_v55  ;;  %4100 = vmatprep.subr.bf16.mxu1 %v4135_v3  ;;  %v3919_v20 = vpop.f32.mrb[161].mxu1 }
 0x31f   :  { %3995 = vmatmul.mubr.msk.f32.vlgmr.msra.gmra.mrb[168].mxu1 %vm2267_vm4, %v2256_v11  ;;  %4006 = vmatmul.mubr.msk.f32.vlgmr.msra.gmra.mrb[168].mxu0 %vm2267_vm4, %v2257_v14  ;;  %v2249_v55 = vadd.f32 %v5301_v44, %v2233_v8 }
 0x320   :  { %4102 = vmatpush3.bf16.msra.mxu1 %v4101_v0  ;;  %4016 = vmatprep.mubr.msk.f32.mxu1 %vm4136_vm0, %v4137_v6 }
 0x321   :  { %4103 = vmatprep.subr.bf16.mxu1 %v4135_v3  ;;  %v2258_v15 = vmax.f32 %v2249_v55, 0.0 }
 0x324   :  { %4105 = vmatpush3.bf16.msra.mxu1 %v4104_v21 }
 0x327   :  { %4017 = vmatmul.mubr.msk.f32.vlgmr.msra.gmra.mrb[170].mxu1 %vm2267_vm4, %v2258_v15 }
 0x3d6   :  { %v2410_v5 = vpop.f32.mrb[162].mxu0 }
 0x3d7   :  { %v3941_v23 = vpop.f32.mrb[163].mxu0 }
 0x3da   :  { %v2337_v24 = vpop.f32.mrb[162].mxu1 }
 0x3db   :  { %v2411_v30 = vadd.f32 %v2410_v5, %v2337_v24  ;;  %v3930_v29 = vpop.f32.mrb[163].mxu1 }
 0x3e2   :  { %v2487_v4 = vpop.f32.mrb[164].mxu1  ;;  %v2565_v31 = vpop.f32.mrb[164].mxu0 }
 0x3e3   :  { %v2491_v18 = vadd.f32 %v2487_v4, %v2411_v30  ;;  %v3952_v2 = vpop.f32.mrb[165].mxu1  ;;  %v3963_v35 = vpop.f32.mrb[165].mxu0 }
 0x3e5   :  { %v2569_v36 = vadd.f32 %v2565_v31, %v2491_v18 }
 0x3ea   :  { %v2643_v6 = vpop.f32.mrb[166].mxu1  ;;  %v2721_v37 = vpop.f32.mrb[166].mxu0 }
 0x3eb   :  { %v2647_v44 = vadd.f32 %v2643_v6, %v2569_v36  ;;  %v3974_v17 = vpop.f32.mrb[167].mxu1  ;;  %v3985_v3 = vpop.f32.mrb[167].mxu0 }
 0x3ed   :  { %v2725_v38 = vadd.f32 %v2721_v37, %v2647_v44 }
 0x3f2   :  { %v2799_v27 = vpop.f32.mrb[168].mxu1  ;;  %v2877_v7 = vpop.f32.mrb[168].mxu0 }
 0x3f3   :  { %v2803_v41 = vadd.f32 %v2799_v27, %v2725_v38  ;;  %v3996_v10 = vpop.f32.mrb[169].mxu1  ;;  %v4007_v43 = vpop.f32.mrb[169].mxu0 }
 0x3f5   :  { %v2881_v26 = vadd.f32 %v2877_v7, %v2803_v41 }
 0x3fa   :  { %v2955_v45 = vpop.f32.mrb[170].mxu1 }
 0x3fb   :  { %v2959_v34 = vadd.f32 %v2955_v45, %v2881_v26  ;;  %v4018_v47 = vpop.f32.mrb[171].mxu1 }
 0x3fd   :  { %v2967_v48 = vadd.f32 %v3157_v25, %v2959_v34 }
 0x3ff   :  { %2968 = vst.msk [vmem:[#allocation2] sm:$0xff] %vm923_vm3, %v2967_v48 }
 0x400   :  { %4122 = shalt.err (!%p4119_p4)
}
 0x401   :  { %s4123_s4 = scalar_lea.hbm %s5459_s7, 128 }
 0x402   :  { %p4124_p5 = scmp.ne.s32.totalorder %s5459_s7, %s4123_s4  ;;  %p4127_p6 = scmp.lt.u32.totalorder %s4123_s4, %s5459_s7 }
 0x404   :  { %p4129_p7 = pnand %p4127_p6, %p4124_p5 }
 0x406   :  { %4132 = shalt.err (!%p4129_p7)
}
 0x407   :  { %2978 = dma.vmem_to_hbm [thread:$0]  %s2976_s13, 128, %s5459_s7, [#allocation3]  }
 0x408   :  { %4133 = dma.done.wait [#allocation3], 128  }
 0x409   :  { %4134 = vsyncadd [#allocation3], 4294967168 }
 0x40a   :  { %2982 = vsyncpa [#allocation3], 1 }

</bundles_post_ra>
